<compile_context>
chip_gen: v5e
topology: v5e:2x2
jax: 0.10.0
libtpu: 0.0.40
codegen_flags: <defaults>
</compile_context>

<pallas_src>
import jax
import jax.numpy as jnp
from jax import lax
from jax.experimental import pallas as pl
from jax.experimental.pallas import tpu as pltpu

# Module hyper-parameters (from the PyTorch spec).
CIN, COUT = 45, 13
KH, KW = 12, 45
STRIDE = (12, 45)
PADDING = (4, 44)

M = COUT * KH * KW                                  # 7020 GEMM output columns
GRID_M = 1                                          # sweepable: 1, or 2 for v7x 2-TC split
_ALIGN = 128 * GRID_M
M_PAD = ((M + _ALIGN - 1) // _ALIGN) * _ALIGN       # 7040 for GRID_M=1
BLOCK_M = M_PAD // GRID_M


def convt_sigmoid_kernel(x_ref, w_ref, b_ref, o_ref):
    # x_ref: (Cin, P) f32 (natural NCHW layout); cast to bf16 in-register.
    x_bf = x_ref[...].astype(jnp.bfloat16)
    # Transposed-lhs matmul on the MXU: contract dim 0 of both operands,
    # bf16 operands, f32 accumulation -> (P, BLOCK_M).
    acc = lax.dot_general(
        x_bf, w_ref[...],
        dimension_numbers=(((0,), (0,)), ((), ())),
        preferred_element_type=jnp.float32,
    )
    z = acc + b_ref[...]                            # bias add in f32 (exact)
    # sigmoid(z) == 0.5 * tanh(0.5 * z) + 0.5 -> single EUP transcendental.
    o_ref[...] = (0.5 * jnp.tanh(0.5 * z) + 0.5).astype(o_ref.dtype)


def prepare_weights(w, b):
    """Static per-parameter prep (hoisted out of the forward path, run once).

    w: (Cin, Cout, KH, KW), b: (Cout,)  ->  w_mat (Cin, M_PAD) bf16, b_mat (1, M_PAD) f32.
    """
    w_mat = w.reshape(CIN, M).astype(jnp.bfloat16)       # columns ordered (co, kh, kw)
    b_mat = jnp.repeat(b, KH * KW)[None, :]              # bias repeated over (kh, kw)
    w_mat = jnp.pad(w_mat, ((0, 0), (0, M_PAD - M)))     # zero-pad lane dim -> 128-aligned
    b_mat = jnp.pad(b_mat, ((0, 0), (0, M_PAD - M)))
    return w_mat, b_mat


@jax.jit
def conv_transpose_sigmoid(x, w_mat, b_mat):
    """x: (1, Cin, H, W) NCHW f32; w_mat/b_mat from prepare_weights()."""
    N, Cin, H, W = x.shape
    assert N == 1 and Cin == CIN
    sh, sw = STRIDE
    ph, pw = PADDING
    # Non-overlapping-patch trick is only valid because stride == kernel size.
    assert (sh, sw) == (KH, KW)

    P = H * W
    x_mat = x.reshape(Cin, P)                            # free reshape, no transpose copy

    out_mat = pl.pallas_call(
        convt_sigmoid_kernel,
        out_shape=jax.ShapeDtypeStruct((P, M_PAD), jnp.bfloat16),
        grid=(GRID_M,),
        in_specs=[
            pl.BlockSpec((Cin, P), lambda j: (0, 0)),          # tiny x, resident
            pl.BlockSpec((Cin, BLOCK_M), lambda j: (0, j)),    # bf16 weight chunk(s)
            pl.BlockSpec((1, BLOCK_M), lambda j: (0, j)),
        ],
        out_specs=pl.BlockSpec((P, BLOCK_M), lambda j: (0, j)),
        compiler_params=pltpu.CompilerParams(
            dimension_semantics=("parallel",)),
    )(x_mat, w_mat, b_mat)

    # Epilogue (same jit/program): scatter the non-overlapping patches into the
    # uncropped output grid, then apply the transposed-conv output cropping.
    full = out_mat[:, :M].reshape(H, W, COUT, KH, KW)          # (ih, iw, co, kh, kw)
    full = full.transpose(2, 0, 3, 1, 4).reshape(COUT, H * KH, W * KW)
    H_out = (H - 1) * sh - 2 * ph + KH
    W_out = (W - 1) * sw - 2 * pw + KW
    out = full[:, ph:ph + H_out, pw:pw + W_out].astype(jnp.float32)
    return out[None]                                           # (1, Cout, H_out, W_out)


def reference(x, w, b, stride, padding):
    """Pure-JAX f32 reference: ConvTranspose2d via conv_general_dilated + sigmoid."""
    sh, sw = stride
    ph, pw = padding
    kh, kw = w.shape[2], w.shape[3]
    w_flip = w[:, :, ::-1, ::-1]                         # flip spatial dims
    w_oihw = jnp.transpose(w_flip, (1, 0, 2, 3))         # (Cout, Cin, KH, KW)
    out = lax.conv_general_dilated(
        x, w_oihw,
        window_strides=(1, 1),
        padding=[(kh - 1 - ph, kh - 1 - ph), (kw - 1 - pw, kw - 1 - pw)],
        lhs_dilation=(sh, sw),
        dimension_numbers=("NCHW", "OIHW", "NCHW"),
    )
    return jax.nn.sigmoid(out + b[None, :, None, None])


if __name__ == "__main__":
    key = jax.random.PRNGKey(0)
    kx, kw_, kb = jax.random.split(key, 3)

    H_in, W_in = 4, 4
    # Deterministic synthetic parameters (same shapes as nn.ConvTranspose2d init).
    x = jax.random.normal(kx, (1, CIN, H_in, W_in), dtype=jnp.float32)
    bound = 1.0 / (CIN * KH * KW) ** 0.5
    w = jax.random.uniform(kw_, (CIN, COUT, KH, KW), jnp.float32, -bound, bound)
    b = jax.random.uniform(kb, (COUT,), jnp.float32, -bound, bound)

    # Weight prep done once (hoisted); forward is a single jitted program.
    w_mat, b_mat = prepare_weights(w, b)

    out = jax.block_until_ready(conv_transpose_sigmoid(x, w_mat, b_mat))
    assert out.shape == (1, 13, 40, 92), out.shape

    ref = jax.block_until_ready(reference(x, w, b, STRIDE, PADDING))
    # bf16 weights + bf16 sigmoid store -> ~1e-3 worst-case error vs. f32 ref.
    max_err = float(jnp.max(jnp.abs(out - ref)))
    assert max_err < 5e-3, max_err

    print("KERNEL_OK")
</pallas_src>

<mosaic_0001>
module attributes {stable_mosaic.version = 11 : i64} {
  func.func @convt_sigmoid_kernel(%arg0: i32, %arg1: memref<45x16xf32, #tpu.memory_space<vmem>>, %arg2: memref<45x7040xbf16, #tpu.memory_space<vmem>>, %arg3: memref<1x7040xf32, #tpu.memory_space<vmem>>, %arg4: memref<16x7040xbf16, #tpu.memory_space<vmem>>) attributes {dimension_semantics = [#tpu.dimension_semantics<parallel>], iteration_bounds = array<i64: 1>, scalar_prefetch = 0 : i64, scratch_operands = 0 : i64, tpu.core_type = #tpu.core_type<tc>, window_params = [{pipeline_mode = #tpu.pipeline_mode<synchronous>, transform_indices = @transform_0, window_bounds = array<i64: 45, 16>}, {transform_indices = @transform_1, window_bounds = array<i64: 45, 7040>}, {transform_indices = @transform_2, window_bounds = array<i64: 1, 7040>}, {transform_indices = @transform_3, window_bounds = array<i64: 16, 7040>}]} {
    %c0 = arith.constant 0 : index
    %c0_0 = arith.constant 0 : index
    %0 = vector.load %arg1[%c0, %c0_0] : memref<45x16xf32, #tpu.memory_space<vmem>>, vector<45x16xf32>
    %1 = arith.truncf %0 : vector<45x16xf32> to vector<45x16xbf16>
    %c0_1 = arith.constant 0 : index
    %c0_2 = arith.constant 0 : index
    %2 = vector.load %arg2[%c0_1, %c0_2] : memref<45x7040xbf16, #tpu.memory_space<vmem>>, vector<45x7040xbf16>
    %cst = arith.constant dense<0.000000e+00> : vector<16x7040xf32>
    %3 = tpu.matmul %1, %2, %cst {dimension_numbers = #tpu.dot_dimension_numbers<[0], [0], [1], [1], [0, 1, 1, 1], [], []>} : vector<45x16xbf16>, vector<45x7040xbf16>, vector<16x7040xf32> -> vector<16x7040xf32>
    %c0_3 = arith.constant 0 : index
    %c0_4 = arith.constant 0 : index
    %4 = vector.load %arg3[%c0_3, %c0_4] : memref<1x7040xf32, #tpu.memory_space<vmem>>, vector<1x7040xf32>
    %5 = vector.broadcast %4 : vector<1x7040xf32> to vector<16x7040xf32>
    %6 = arith.addf %3, %5 : vector<16x7040xf32>
    %cst_5 = arith.constant 5.000000e-01 : f32
    %7 = vector.broadcast %cst_5 : f32 to vector<16x7040xf32>
    %8 = arith.mulf %7, %6 : vector<16x7040xf32>
    %9 = math.tanh %8 : vector<16x7040xf32>
    %cst_6 = arith.constant 5.000000e-01 : f32
    %10 = vector.broadcast %cst_6 : f32 to vector<16x7040xf32>
    %11 = arith.mulf %10, %9 : vector<16x7040xf32>
    %cst_7 = arith.constant 5.000000e-01 : f32
    %12 = vector.broadcast %cst_7 : f32 to vector<16x7040xf32>
    %13 = arith.addf %11, %12 : vector<16x7040xf32>
    %14 = arith.truncf %13 : vector<16x7040xf32> to vector<16x7040xbf16>
    %c0_8 = arith.constant 0 : index
    %c0_9 = arith.constant 0 : index
    %15 = vector.load %arg4[%c0_8, %c0_9] : memref<16x7040xbf16, #tpu.memory_space<vmem>>, vector<16x7040xbf16>
    tpu.vector_store %arg4[%c0_8, %c0_9], %14 {strides = array<i32>} : memref<16x7040xbf16, #tpu.memory_space<vmem>>, vector<16x7040xbf16>,
    return
  }
  func.func @transform_0(%arg0: i32) -> (i32, i32) {
    %c0_i32 = arith.constant 0 : i32
    %c0_i32_0 = arith.constant 0 : i32
    %c0_i32_1 = arith.constant 0 : i32
    return %c0_i32, %c0_i32_0 : i32, i32
  }
  func.func @transform_1(%arg0: i32) -> (i32, i32) {
    %c0_i32 = arith.constant 0 : i32
    %c0_i32_0 = arith.constant 0 : i32
    return %c0_i32, %arg0 : i32, i32
  }
  func.func @transform_2(%arg0: i32) -> (i32, i32) {
    %c0_i32 = arith.constant 0 : i32
    %c0_i32_0 = arith.constant 0 : i32
    return %c0_i32, %arg0 : i32, i32
  }
  func.func @transform_3(%arg0: i32) -> (i32, i32) {
    %c0_i32 = arith.constant 0 : i32
    %c0_i32_0 = arith.constant 0 : i32
    return %c0_i32, %arg0 : i32, i32
  }
}

</mosaic_0001>

<bundles_post_ra>
// kernel: conv_transpose_sigmoid.1
= control target key start
LH: loop header
LB: loop body
LE: loop exit
PB: predicated region body
PF: predicated region fallthrough
CT: control target
= control target key end

     0   :  { %8 = vsyncpa [#allocation3], 0  ;;  %s3752_s15 = smov [#allocation2]   ;;  %s3753_s17 = smov 3520   ;;  %s4358_s0 = inlined_call_operand.vmem [shape: f32[45,16], index: 0, kind: input, shape index: {}]   ;;  %s4359_s1 = inlined_call_operand.hbm [shape: bf16[45,7040], index: 1, kind: input, shape index: {}]   ;;  %s4360_s2 = inlined_call_operand.vmem [shape: f32[1,7040], index: 2, kind: input, shape index: {}]   ;;  %s4361_s3 = inlined_call_operand.vmem [shape: bf16[16,7040], index: 3, kind: output, shape index: {}]  }
   0x1   :  { %s15_s14 = sshll.u32 %s4359_s1, 4  ;;  %s17_s16 = sshll.u32 %s3752_s15, 4  ;;  %s16_s14 = int_to_ptr.hbm [resolvable:$true] %s15_s14  ;;  %s18_s16 = int_to_ptr.vmem [resolvable:$true] %s17_s16 }
   0x2   :  { %s3754_s18 = smov 220  }
   0x3   :  { %23 = dma.hbm_to_vmem [thread:$0]  %s16_s14, 21120, %s18_s16, [#allocation3], %s3753_s17, %s3753_s17, %s3754_s18  }
   0x4   :  { %3750 = dma.done.wait [#allocation3], 21120  }
   0x5   :  { %3751 = vsyncadd [#allocation3], 4294946176  ;;  %v31_v0 = vld [vmem:[%s4358_s0] sm:$0xff]  ;;  %v32_v1 = vld [vmem:[%s4358_s0 + $0x8] sm:$0xff]  ;;  %vm1125_vm0 = vcmask 1045504   ;;  %vm1126_vm1 = vcmask 1046528  }
   0x6   :  { %v37_v2 = vpack.c.bf16 %v32_v1, %v31_v0  ;;  %v3063_v3 = vld [vmem:[#allocation2 + $0x370] sm:$0xf]  ;;  %v3473_v4 = vld [vmem:[#allocation2 + $0x448] sm:$0x70]  ;;  %v3446_v6 = vld [vmem:[#allocation2 + $0x374] sm:$0xf] }
   0x7   :  { %v3064_v5 = vor.u32 %v3473_v4, %v3063_v3  ;;  %v3065_v7 = vld [vmem:[#allocation2 + $0x44c] sm:$0x70]  ;;  %v3755_v8 = vmov 65535   ;;  %v3071_v11 = vld [vmem:[#allocation2 + $0x378] sm:$0xf]  ;;  %v35_v49 = vld [vmem:[%s4358_s0 + $0x20] sm:$0xff] }
   0x8   :  { %332 = vxpose.xlu0.c.b16.start [1/3] (short) (narrow) %v37_v2, 16  ;;  %v1127_v9 = vsel %vm1125_vm0, 4294967295, %v3755_v8  ;;  %v3068_v10 = vor.u32 %v3446_v6, %v3065_v7  ;;  %v3474_v12 = vld [vmem:[#allocation2 + $0x450] sm:$0x70]  ;;  %v3447_v15 = vld [vmem:[#allocation2 + $0x37c] sm:$0xf] }
   0x9   :  { %v3785_v13 = vsel %vm1126_vm1, %v1127_v9, 0  ;;  %v3072_v14 = vor.u32 %v3474_v12, %v3071_v11  ;;  %v3073_v16 = vld [vmem:[#allocation2 + $0x454] sm:$0x70]  ;;  %v3418_v21 = vld [vmem:[#allocation2 + $0x290] sm:$0xf0]  ;;  %vm1121_vm2 = vcmask 367616  }
   0xa   :  { %v1130_v17 = vand.u32 %v3064_v5, %v3785_v13  ;;  %v1133_v18 = vand.u32 %v3068_v10, %v3785_v13  ;;  %v3076_v19 = vor.u32 %v3447_v15, %v3073_v16  ;;  %v2843_v20 = vld [vmem:[#allocation2 + $0x1b8] sm:$0xf]  ;;  %v3391_v22 = vld [vmem:[#allocation2 + $0x1bc] sm:$0xf]  ;;  %v2851_v25 = vld [vmem:[#allocation2 + $0x1c0] sm:$0xf] }
   0xb   :  { %v1136_v23 = vand.u32 %v3072_v14, %v3785_v13  ;;  %v2845_v24 = vld [vmem:[#allocation2 + $0x294] sm:$0xf0]  ;;  %v3419_v26 = vld [vmem:[#allocation2 + $0x298] sm:$0xf0]  ;;  %v2844_v28 = vor.u32 %v3418_v21, %v2843_v20  ;;  %v3392_v30 = vld [vmem:[#allocation2 + $0x1c4] sm:$0xf] }
   0xc   :  { %1299 = vmatpush.bf16.msra.mxu0 %v1130_v17  ;;  %1313 = vmatpush.bf16.msra.mxu1 %v1133_v18  ;;  %v1139_v27 = vand.u32 %v3076_v19, %v3785_v13  ;;  %v2848_v29 = vor.u32 %v3391_v22, %v2845_v24  ;;  %v2853_v31 = vld [vmem:[#allocation2 + $0x29c] sm:$0xf0]  ;;  %v2852_v33 = vor.u32 %v3419_v26, %v2851_v25  ;;  %v3363_v34 = vld [vmem:[#allocation2 + $0xd8] sm:$0xf0]  ;;  %v3336_v35 = vld [vmem:[#allocation2 + $0x4] sm:$0xf] }
   0xd   :  { %v2623_v32 = vld [vmem:[#allocation2] sm:$0xf]  ;;  %1327 = vmatpush.bf16.msra.mxu2 %v1136_v23  ;;  %v33_v37 = vld [vmem:[%s4358_s0 + $0x10] sm:$0xff]  ;;  %v2856_v38 = vor.u32 %v3392_v30, %v2853_v31  ;;  %v2631_v39 = vld [vmem:[#allocation2 + $0x8] sm:$0xf] }
   0xe   :  { %v2625_v36 = vld [vmem:[#allocation2 + $0xdc] sm:$0xf0]  ;;  %1341 = vmatpush.bf16.msra.mxu3 %v1139_v27  ;;  %v3364_v40 = vld [vmem:[#allocation2 + $0xe0] sm:$0xf0]  ;;  %v34_v41 = vld [vmem:[%s4358_s0 + $0x18] sm:$0xff]  ;;  %v2624_v44 = vor.u32 %v3363_v34, %v2623_v32 }
   0xf   :  { %v3337_v42 = vld [vmem:[#allocation2 + $0xc] sm:$0xf]  ;;  %v2633_v43 = vld [vmem:[#allocation2 + $0xe4] sm:$0xf0]  ;;  %v2628_v45 = vor.u32 %v3336_v35, %v2625_v36  ;;  %v2632_v46 = vor.u32 %v3364_v40, %v2631_v39  ;;  %v38_v47 = vpack.c.bf16 %v34_v41, %v33_v37  ;;  %v3476_v53 = vld [vmem:[#allocation2 + $0x460] sm:$0x70] }
  0x10   :  { %1300 = vmatpush.bf16.msra.mxu0 %v2844_v28  ;;  %1314 = vmatpush.bf16.msra.mxu1 %v2848_v29  ;;  %v2636_v48 = vor.u32 %v3337_v42, %v2633_v43  ;;  %v36_v50 = vld [vmem:[%s4358_s0 + $0x28] sm:$0x1f]  ;;  %v3079_v54 = vld [vmem:[#allocation2 + $0x380] sm:$0xf]  ;;  %v3475_v56 = vld [vmem:[#allocation2 + $0x458] sm:$0x70] }
  0x11   :  { %1328 = vmatpush.bf16.msra.mxu2 %v2852_v33  ;;  %v39_v51 = vpack.c.bf16 %v36_v50, %v35_v49  ;;  %v3087_v52 = vld [vmem:[#allocation2 + $0x388] sm:$0xf]  ;;  %v3448_v57 = vld [vmem:[#allocation2 + $0x384] sm:$0xf]  ;;  %v3081_v58 = vld [vmem:[#allocation2 + $0x45c] sm:$0x70]  ;;  %v3080_v59 = vor.u32 %v3475_v56, %v3079_v54 }
  0x12   :  { %1342 = vmatpush.bf16.msra.mxu3 %v2856_v38  ;;  %v3088_v55 = vor.u32 %v3476_v53, %v3087_v52  ;;  %v3084_v60 = vor.u32 %v3448_v57, %v3081_v58  ;;  %v3449_v61 = vld [vmem:[#allocation2 + $0x38c] sm:$0xf]  ;;  %v3089_v62 = vld [vmem:[#allocation2 + $0x464] sm:$0x70]  ;;  %v2867_v63 = vld [vmem:[#allocation2 + $0x1d0] sm:$0xf] }
  0x13   :  { %v3092_v1 = vor.u32 %v3449_v61, %v3089_v62  ;;  %v3421_v2 = vld [vmem:[#allocation2 + $0x2a8] sm:$0xf0]  ;;  %v2859_v3 = vld [vmem:[#allocation2 + $0x1c8] sm:$0xf]  ;;  %v3420_v4 = vld [vmem:[#allocation2 + $0x2a0] sm:$0xf0]  ;;  %v1142_v5 = vand.u32 %v3080_v59, %v3785_v13 }
  0x14   :  { %1301 = vmatpush.bf16.msra.mxu0 %v2624_v44  ;;  %1315 = vmatpush.bf16.msra.mxu1 %v2628_v45  ;;  %v1148_v0 = vand.u32 %v3088_v55, %v3785_v13  ;;  %v1145_v6 = vand.u32 %v3084_v60, %v3785_v13  ;;  %v3393_v7 = vld [vmem:[#allocation2 + $0x1cc] sm:$0xf]  ;;  %v2861_v8 = vld [vmem:[#allocation2 + $0x2a4] sm:$0xf0]  ;;  %v3394_v9 = vld [vmem:[#allocation2 + $0x1d4] sm:$0xf]  ;;  %v2868_v11 = vor.u32 %v3421_v2, %v2867_v63 }
  0x15   :  { %1329 = vmatpush.bf16.msra.mxu2 %v2632_v46  ;;  %v1151_v10 = vand.u32 %v3092_v1, %v3785_v13  ;;  %v2869_v12 = vld [vmem:[#allocation2 + $0x2ac] sm:$0xf0]  ;;  %v2860_v14 = vor.u32 %v3420_v4, %v2859_v3  ;;  %v2864_v15 = vor.u32 %v3393_v7, %v2861_v8  ;;  %v2647_v16 = vld [vmem:[#allocation2 + $0x18] sm:$0xf]  ;;  %v3366_v17 = vld [vmem:[#allocation2 + $0xf0] sm:$0xf0] }
  0x16   :  { %1343 = vmatpush.bf16.msra.mxu3 %v2636_v48  ;;  %v2639_v18 = vld [vmem:[#allocation2 + $0x10] sm:$0xf]  ;;  %v2872_v19 = vor.u32 %v3394_v9, %v2869_v12  ;;  %v3365_v20 = vld [vmem:[#allocation2 + $0xe8] sm:$0xf0]  ;;  %v3338_v21 = vld [vmem:[#allocation2 + $0x14] sm:$0xf]  ;;  %v2648_v25 = vor.u32 %v3366_v17, %v2647_v16 }
  0x17   :  { %v2641_v22 = vld [vmem:[#allocation2 + $0xec] sm:$0xf0]  ;;  %v3339_v23 = vld [vmem:[#allocation2 + $0x1c] sm:$0xf]  ;;  %v2649_v24 = vld [vmem:[#allocation2 + $0xf4] sm:$0xf0]  ;;  %v2640_v26 = vor.u32 %v3365_v20, %v2639_v18 }
  0x18   :  { %333 = vxpose.xlu0.c.b16.cont [2/3] (short) (narrow) %v38_v47, 16  ;;  %1355 = vmatpush.bf16.msrb.mxu0 %v1142_v5  ;;  %v2644_v27 = vor.u32 %v3338_v21, %v2641_v22  ;;  %v2652_v28 = vor.u32 %v3339_v23, %v2649_v24  ;;  %v3103_v29 = vld [vmem:[#allocation2 + $0x398] sm:$0xf]  ;;  %v3478_v30 = vld [vmem:[#allocation2 + $0x470] sm:$0x70] }
  0x19   :  { %1383 = vmatpush.bf16.msrb.mxu2 %v1148_v0  ;;  %1369 = vmatpush.bf16.msrb.mxu1 %v1145_v6  ;;  %v3095_v31 = vld [vmem:[#allocation2 + $0x390] sm:$0xf]  ;;  %v3477_v32 = vld [vmem:[#allocation2 + $0x468] sm:$0x70]  ;;  %v3450_v33 = vld [vmem:[#allocation2 + $0x394] sm:$0xf]  ;;  %v3104_v37 = vor.u32 %v3478_v30, %v3103_v29 }
  0x1a   :  { %1397 = vmatpush.bf16.msrb.mxu3 %v1151_v10  ;;  %v3097_v34 = vld [vmem:[#allocation2 + $0x46c] sm:$0x70]  ;;  %v3451_v35 = vld [vmem:[#allocation2 + $0x39c] sm:$0xf]  ;;  %v3105_v36 = vld [vmem:[#allocation2 + $0x474] sm:$0x70]  ;;  %v3096_v38 = vor.u32 %v3477_v32, %v3095_v31 }
  0x1b   :  { %v3100_v39 = vor.u32 %v3450_v33, %v3097_v34  ;;  %v3108_v40 = vor.u32 %v3451_v35, %v3105_v36  ;;  %v1160_v41 = vand.u32 %v3104_v37, %v3785_v13  ;;  %v2883_v43 = vld [vmem:[#allocation2 + $0x1e0] sm:$0xf]  ;;  %v3423_v44 = vld [vmem:[#allocation2 + $0x2b8] sm:$0xf0]  ;;  %v2875_v48 = vld [vmem:[#allocation2 + $0x1d8] sm:$0xf] }
  0x1c   :  { %1356 = vmatpush.bf16.msrb.mxu0 %v2860_v14  ;;  %v1154_v42 = vand.u32 %v3096_v38, %v3785_v13  ;;  %v3422_v49 = vld [vmem:[#allocation2 + $0x2b0] sm:$0xf0]  ;;  %v3395_v50 = vld [vmem:[#allocation2 + $0x1dc] sm:$0xf]  ;;  %v3396_v52 = vld [vmem:[#allocation2 + $0x1e4] sm:$0xf]  ;;  %v2884_v54 = vor.u32 %v3423_v44, %v2883_v43 }
  0x1d   :  { %1384 = vmatpush.bf16.msrb.mxu2 %v2868_v11  ;;  %1370 = vmatpush.bf16.msrb.mxu1 %v2864_v15  ;;  %v1157_v46 = vand.u32 %v3100_v39, %v3785_v13  ;;  %v1163_v47 = vand.u32 %v3108_v40, %v3785_v13  ;;  %v2885_v53 = vld [vmem:[#allocation2 + $0x2bc] sm:$0xf0]  ;;  %v2876_v55 = vor.u32 %v3422_v49, %v2875_v48  ;;  %v2663_v56 = vld [vmem:[#allocation2 + $0x28] sm:$0xf]  ;;  %v3368_v57 = vld [vmem:[#allocation2 + $0x100] sm:$0xf0] }
  0x1e   :  { %1398 = vmatpush.bf16.msrb.mxu3 %v2872_v19  ;;  %v2888_v59 = vor.u32 %v3396_v52, %v2885_v53  ;;  %v2655_v60 = vld [vmem:[#allocation2 + $0x20] sm:$0xf]  ;;  %v3367_v61 = vld [vmem:[#allocation2 + $0xf8] sm:$0xf0]  ;;  %v3340_v62 = vld [vmem:[#allocation2 + $0x24] sm:$0xf]  ;;  %v2664_v2 = vor.u32 %v3368_v57, %v2663_v56 }
  0x1f   :  { %v2657_v63 = vld [vmem:[#allocation2 + $0xfc] sm:$0xf0]  ;;  %v3341_v0 = vld [vmem:[#allocation2 + $0x2c] sm:$0xf]  ;;  %v2665_v1 = vld [vmem:[#allocation2 + $0x104] sm:$0xf0]  ;;  %v2656_v3 = vor.u32 %v3367_v61, %v2655_v60 }
  0x20   :  { %1357 = vmatpush.bf16.msrb.mxu0 %v2640_v26  ;;  %v3119_v4 = vld [vmem:[#allocation2 + $0x3a8] sm:$0xf]  ;;  %v3480_v5 = vld [vmem:[#allocation2 + $0x480] sm:$0x70]  ;;  %v2660_v6 = vor.u32 %v3340_v62, %v2657_v63  ;;  %v2668_v7 = vor.u32 %v3341_v0, %v2665_v1  ;;  %v3111_v8 = vld [vmem:[#allocation2 + $0x3a0] sm:$0xf] }
  0x21   :  { %1385 = vmatpush.bf16.msrb.mxu2 %v2648_v25  ;;  %1371 = vmatpush.bf16.msrb.mxu1 %v2644_v27  ;;  %v3479_v9 = vld [vmem:[#allocation2 + $0x478] sm:$0x70]  ;;  %v3452_v10 = vld [vmem:[#allocation2 + $0x3a4] sm:$0xf]  ;;  %v3113_v11 = vld [vmem:[#allocation2 + $0x47c] sm:$0x70]  ;;  %v3120_v15 = vor.u32 %v3480_v5, %v3119_v4 }
  0x22   :  { %1399 = vmatpush.bf16.msrb.mxu3 %v2652_v28  ;;  %v3453_v12 = vld [vmem:[#allocation2 + $0x3ac] sm:$0xf]  ;;  %v3121_v14 = vld [vmem:[#allocation2 + $0x484] sm:$0x70]  ;;  %v3112_v16 = vor.u32 %v3479_v9, %v3111_v8  ;;  %v3116_v17 = vor.u32 %v3452_v10, %v3113_v11  ;;  %v2899_v21 = vld [vmem:[#allocation2 + $0x1f0] sm:$0xf] }
  0x23   :  { %v3124_v18 = vor.u32 %v3453_v12, %v3121_v14  ;;  %v1172_v19 = vand.u32 %v3120_v15, %v3785_v13  ;;  %v3425_v22 = vld [vmem:[#allocation2 + $0x2c8] sm:$0xf0]  ;;  %v2891_v25 = vld [vmem:[#allocation2 + $0x1e8] sm:$0xf]  ;;  %v3424_v26 = vld [vmem:[#allocation2 + $0x2c0] sm:$0xf0] }
  0x24   :  { %v1166_v20 = vand.u32 %v3112_v16, %v3785_v13  ;;  %v1169_v23 = vand.u32 %v3116_v17, %v3785_v13  ;;  %v3397_v27 = vld [vmem:[#allocation2 + $0x1ec] sm:$0xf]  ;;  %v2893_v28 = vld [vmem:[#allocation2 + $0x2c4] sm:$0xf0]  ;;  %v3398_v29 = vld [vmem:[#allocation2 + $0x1f4] sm:$0xf]  ;;  %v2900_v31 = vor.u32 %v3425_v22, %v2899_v21  ;;  %v2892_v32 = vor.u32 %v3424_v26, %v2891_v25 }
  0x25   :  { %v1175_v24 = vand.u32 %v3124_v18, %v3785_v13  ;;  %v2901_v30 = vld [vmem:[#allocation2 + $0x2cc] sm:$0xf0]  ;;  %v2679_v33 = vld [vmem:[#allocation2 + $0x38] sm:$0xf]  ;;  %v3370_v34 = vld [vmem:[#allocation2 + $0x110] sm:$0xf0]  ;;  %v2896_v35 = vor.u32 %v3397_v27, %v2893_v28 }
  0x26   :  { %v2904_v36 = vor.u32 %v3398_v29, %v2901_v30  ;;  %v2671_v37 = vld [vmem:[#allocation2 + $0x30] sm:$0xf]  ;;  %v3369_v38 = vld [vmem:[#allocation2 + $0x108] sm:$0xf0]  ;;  %v3342_v39 = vld [vmem:[#allocation2 + $0x34] sm:$0xf]  ;;  %v2680_v43 = vor.u32 %v3370_v34, %v2679_v33 }
  0x27   :  { %v2673_v40 = vld [vmem:[#allocation2 + $0x10c] sm:$0xf0]  ;;  %v2672_v44 = vor.u32 %v3369_v38, %v2671_v37  ;;  %v3454_v52 = vld [vmem:[#allocation2 + $0x3b4] sm:$0xf]  ;;  %v2915_v62 = vld [vmem:[#allocation2 + $0x200] sm:$0xf] }
  0x28   :  { %334 = vxpose.xlu0.c.b16.end [3/3] (short) (narrow) %v39_v51, 16  ;;  %v2877_v51 = vld [vmem:[#allocation2 + $0x2b4] sm:$0xf0]  ;;  %v2676_v48 = vor.u32 %v3342_v39, %v2673_v40  ;;  %v3129_v53 = vld [vmem:[#allocation2 + $0x48c] sm:$0x70] }
  0x29   :  { %v2880_v58 = vor.u32 %v3395_v50, %v2877_v51  ;;  %v3127_v50 = vld [vmem:[#allocation2 + $0x3b0] sm:$0xf]  ;;  %v3481_v51 = vld [vmem:[#allocation2 + $0x488] sm:$0x70]  ;;  %v3427_v63 = vld [vmem:[#allocation2 + $0x2d8] sm:$0xf0] }
  0x2a   :  { %v3128_v57 = vor.u32 %v3481_v51, %v3127_v50  ;;  %v3399_v4 = vld [vmem:[#allocation2 + $0x1fc] sm:$0xf]  ;;  %v2909_v5 = vld [vmem:[#allocation2 + $0x2d4] sm:$0xf0]  ;;  %v2916_v8 = vor.u32 %v3427_v63, %v2915_v62  ;;  %v2695_v10 = vld [vmem:[#allocation2 + $0x48] sm:$0xf] }
  0x2b   :  { %v3372_v11 = vld [vmem:[#allocation2 + $0x120] sm:$0xf0]  ;;  %v2912_v12 = vor.u32 %v3399_v4, %v2909_v5  ;;  %v2687_v15 = vld [vmem:[#allocation2 + $0x40] sm:$0xf]  ;;  %v3371_v16 = vld [vmem:[#allocation2 + $0x118] sm:$0xf0] }
  0x2c   :  { %v1178_v61 = vand.u32 %v3128_v57, %v3785_v13  ;;  %v3344_v17 = vld [vmem:[#allocation2 + $0x44] sm:$0xf]  ;;  %v2689_v18 = vld [vmem:[#allocation2 + $0x11c] sm:$0xf0]  ;;  %v2696_v21 = vor.u32 %v3372_v11, %v2695_v10  ;;  %v2688_v22 = vor.u32 %v3371_v16, %v2687_v15  ;;  %v3483_v28 = vld [vmem:[#allocation2 + $0x498] sm:$0x70] }
  0x2d   :  { %v2692_v25 = vor.u32 %v3344_v17, %v2689_v18  ;;  %v3143_v27 = vld [vmem:[#allocation2 + $0x3c0] sm:$0xf]  ;;  %v3456_v29 = vld [vmem:[#allocation2 + $0x3c4] sm:$0xf]  ;;  %v2931_v39 = vld [vmem:[#allocation2 + $0x210] sm:$0xf] }
  0x2e   :  { %v3145_v30 = vld [vmem:[#allocation2 + $0x49c] sm:$0x70]  ;;  %v3144_v34 = vor.u32 %v3483_v28, %v3143_v27  ;;  %v3429_v40 = vld [vmem:[#allocation2 + $0x2e8] sm:$0xf0]  ;;  %v3159_v4 = vld [vmem:[#allocation2 + $0x3d0] sm:$0xf] }
  0x2f   :  { %v2932_v50 = vor.u32 %v3429_v40, %v2931_v39  ;;  %v3373_v57 = vld [vmem:[#allocation2 + $0x128] sm:$0xf0]  ;;  %v2947_v17 = vld [vmem:[#allocation2 + $0x220] sm:$0xf]  ;;  %v3431_v18 = vld [vmem:[#allocation2 + $0x2f8] sm:$0xf0] }
  0x30   :  { %v1190_v38 = vand.u32 %v3144_v34, %v3785_v13  ;;  %v3485_v5 = vld [vmem:[#allocation2 + $0x4a8] sm:$0x70]  ;;  %v2948_v27 = vor.u32 %v3431_v18, %v2947_v17  ;;  %v3375_v34 = vld [vmem:[#allocation2 + $0x138] sm:$0xf0] }
  0x31   :  { %v3160_v11 = vor.u32 %v3485_v5, %v3159_v4 }
  0x33   :  { %v1202_v16 = vand.u32 %v3160_v11, %v3785_v13  ;;  %v3377_v11 = vld [vmem:[#allocation2 + $0x148] sm:$0xf0] }
  0xb4   :  { %v3809_v45 = vpop.trf.xlu0 }
  0xb5   :  { %3281 = vmatmul.msk.bf16.vlgmr.msra.gmra.mxu0 %vm1121_vm2, %v3809_v45  ;;  %3282 = vmatmul.msk.bf16.vlgmr.msra.gmra.mxu1 %vm1121_vm2, %v3809_v45 }
  0xb6   :  { %3283 = vmatmul.msk.bf16.vlgmr.msra.gmra.mxu2 %vm1121_vm2, %v3809_v45  ;;  %3284 = vmatmul.msk.bf16.vlgmr.msra.gmra.mxu3 %vm1121_vm2, %v3809_v45 }
  0xb7   :  { %1439 = vmatpush.bf16.msra.mxu2 %v1160_v41  ;;  %1411 = vmatpush.bf16.msra.mxu0 %v1154_v42  ;;  %v3343_v41 = vld [vmem:[#allocation2 + $0x3c] sm:$0xf]  ;;  %v2681_v42 = vld [vmem:[#allocation2 + $0x114] sm:$0xf0] }
  0xb8   :  { %1425 = vmatpush.bf16.msra.mxu1 %v1157_v46  ;;  %1453 = vmatpush.bf16.msra.mxu3 %v1163_v47  ;;  %v3135_v46 = vld [vmem:[#allocation2 + $0x3b8] sm:$0xf]  ;;  %v3482_v47 = vld [vmem:[#allocation2 + $0x490] sm:$0x70]  ;;  %v2684_v49 = vor.u32 %v3343_v41, %v2681_v42 }
  0xb9   :  { %v3136_v56 = vor.u32 %v3482_v47, %v3135_v46  ;;  %v3401_v46 = vld [vmem:[#allocation2 + $0x20c] sm:$0xf]  ;;  %v2925_v47 = vld [vmem:[#allocation2 + $0x2e4] sm:$0xf0] }
  0xbb   :  { %1440 = vmatpush.bf16.msra.mxu2 %v2884_v54  ;;  %1412 = vmatpush.bf16.msra.mxu0 %v2876_v55  ;;  %v3455_v54 = vld [vmem:[#allocation2 + $0x3bc] sm:$0xf]  ;;  %v3137_v55 = vld [vmem:[#allocation2 + $0x494] sm:$0x70]  ;;  %v1184_v60 = vand.u32 %v3136_v56, %v3785_v13  ;;  %v2703_v56 = vld [vmem:[#allocation2 + $0x50] sm:$0xf] }
  0xbc   :  { %1426 = vmatpush.bf16.msra.mxu1 %v2880_v58  ;;  %1454 = vmatpush.bf16.msra.mxu3 %v2888_v59  ;;  %v3132_v58 = vor.u32 %v3454_v52, %v3129_v53  ;;  %v3140_v59 = vor.u32 %v3455_v54, %v3137_v55  ;;  %v2711_v52 = vld [vmem:[#allocation2 + $0x58] sm:$0xf]  ;;  %v3374_v53 = vld [vmem:[#allocation2 + $0x130] sm:$0xf0]  ;;  %v2928_v54 = vor.u32 %v3401_v46, %v2925_v47  ;;  %v3175_v46 = vld [vmem:[#allocation2 + $0x3e0] sm:$0xf] }
  0xbd   :  { %v2712_v62 = vor.u32 %v3374_v53, %v2711_v52  ;;  %v2704_v63 = vor.u32 %v3373_v57, %v2703_v56  ;;  %v3487_v47 = vld [vmem:[#allocation2 + $0x4b8] sm:$0x70] }
  0xbe   :  { %v1181_v0 = vand.u32 %v3132_v58, %v3785_v13  ;;  %v1187_v1 = vand.u32 %v3140_v59, %v3785_v13  ;;  %v3346_v58 = vld [vmem:[#allocation2 + $0x54] sm:$0xf]  ;;  %v2705_v59 = vld [vmem:[#allocation2 + $0x12c] sm:$0xf0]  ;;  %v3176_v53 = vor.u32 %v3487_v47, %v3175_v46 }
  0xbf   :  { %1441 = vmatpush.bf16.msra.mxu2 %v2664_v2  ;;  %1413 = vmatpush.bf16.msra.mxu0 %v2656_v3  ;;  %v2907_v2 = vld [vmem:[#allocation2 + $0x1f8] sm:$0xf]  ;;  %v3426_v3 = vld [vmem:[#allocation2 + $0x2d0] sm:$0xf0] }
  0xc0   :  { %1427 = vmatpush.bf16.msra.mxu1 %v2660_v6  ;;  %1455 = vmatpush.bf16.msra.mxu3 %v2668_v7  ;;  %v3400_v6 = vld [vmem:[#allocation2 + $0x204] sm:$0xf]  ;;  %v2917_v7 = vld [vmem:[#allocation2 + $0x2dc] sm:$0xf0]  ;;  %v2908_v9 = vor.u32 %v3426_v3, %v2907_v2  ;;  %v2708_v2 = vor.u32 %v3346_v58, %v2705_v59  ;;  %v1214_v57 = vand.u32 %v3176_v53, %v3785_v13  ;;  %v2963_v58 = vld [vmem:[#allocation2 + $0x230] sm:$0xf] }
  0xc1   :  { %v2920_v14 = vor.u32 %v3400_v6, %v2917_v7  ;;  %v3458_v6 = vld [vmem:[#allocation2 + $0x3d4] sm:$0xf]  ;;  %v3161_v7 = vld [vmem:[#allocation2 + $0x4ac] sm:$0x70]  ;;  %v3433_v59 = vld [vmem:[#allocation2 + $0x308] sm:$0xf0] }
  0xc2   :  { %v2964_v4 = vor.u32 %v3433_v59, %v2963_v58  ;;  %v3379_v53 = vld [vmem:[#allocation2 + $0x158] sm:$0xf0] }
  0xc5   :  { %3285 = vmatmul.msk.bf16.vlgmr.msrb.gmra.mxu0 %vm1121_vm2, %v3809_v45  ;;  %3286 = vmatmul.msk.bf16.vlgmr.msrb.gmra.mxu1 %vm1121_vm2, %v3809_v45 }
  0xc6   :  { %3287 = vmatmul.msk.bf16.vlgmr.msrb.gmra.mxu2 %vm1121_vm2, %v3809_v45  ;;  %3288 = vmatmul.msk.bf16.vlgmr.msrb.gmra.mxu3 %vm1121_vm2, %v3809_v45 }
  0xc7   :  { %1495 = vmatpush.bf16.msrb.mxu2 %v1172_v19  ;;  %1467 = vmatpush.bf16.msrb.mxu0 %v1166_v20  ;;  %v3345_v19 = vld [vmem:[#allocation2 + $0x4c] sm:$0xf]  ;;  %v2697_v20 = vld [vmem:[#allocation2 + $0x124] sm:$0xf0] }
  0xc8   :  { %1481 = vmatpush.bf16.msrb.mxu1 %v1169_v23  ;;  %1509 = vmatpush.bf16.msrb.mxu3 %v1175_v24  ;;  %v3151_v23 = vld [vmem:[#allocation2 + $0x3c8] sm:$0xf]  ;;  %v3484_v24 = vld [vmem:[#allocation2 + $0x4a0] sm:$0x70]  ;;  %v2700_v26 = vor.u32 %v3345_v19, %v2697_v20 }
  0xc9   :  { %v3152_v33 = vor.u32 %v3484_v24, %v3151_v23  ;;  %v3403_v23 = vld [vmem:[#allocation2 + $0x21c] sm:$0xf]  ;;  %v2941_v24 = vld [vmem:[#allocation2 + $0x2f4] sm:$0xf0] }
  0xcb   :  { %1496 = vmatpush.bf16.msrb.mxu2 %v2900_v31  ;;  %1468 = vmatpush.bf16.msrb.mxu0 %v2892_v32  ;;  %v3457_v31 = vld [vmem:[#allocation2 + $0x3cc] sm:$0xf]  ;;  %v3153_v32 = vld [vmem:[#allocation2 + $0x4a4] sm:$0x70]  ;;  %v1196_v37 = vand.u32 %v3152_v33, %v3785_v13  ;;  %v2719_v33 = vld [vmem:[#allocation2 + $0x60] sm:$0xf] }
  0xcc   :  { %1482 = vmatpush.bf16.msrb.mxu1 %v2896_v35  ;;  %1510 = vmatpush.bf16.msrb.mxu3 %v2904_v36  ;;  %v3148_v35 = vor.u32 %v3456_v29, %v3145_v30  ;;  %v3156_v36 = vor.u32 %v3457_v31, %v3153_v32  ;;  %v2727_v29 = vld [vmem:[#allocation2 + $0x68] sm:$0xf]  ;;  %v3376_v30 = vld [vmem:[#allocation2 + $0x140] sm:$0xf0]  ;;  %v2944_v31 = vor.u32 %v3403_v23, %v2941_v24  ;;  %v3191_v23 = vld [vmem:[#allocation2 + $0x3f0] sm:$0xf] }
  0xcd   :  { %v2728_v39 = vor.u32 %v3376_v30, %v2727_v29  ;;  %v2720_v40 = vor.u32 %v3375_v34, %v2719_v33  ;;  %v3489_v24 = vld [vmem:[#allocation2 + $0x4c8] sm:$0x70] }
  0xce   :  { %v1193_v41 = vand.u32 %v3148_v35, %v3785_v13  ;;  %v1199_v42 = vand.u32 %v3156_v36, %v3785_v13  ;;  %v3348_v35 = vld [vmem:[#allocation2 + $0x64] sm:$0xf]  ;;  %v2721_v36 = vld [vmem:[#allocation2 + $0x13c] sm:$0xf0]  ;;  %v3192_v30 = vor.u32 %v3489_v24, %v3191_v23 }
  0xcf   :  { %1497 = vmatpush.bf16.msrb.mxu2 %v2680_v43  ;;  %1469 = vmatpush.bf16.msrb.mxu0 %v2672_v44  ;;  %v2923_v43 = vld [vmem:[#allocation2 + $0x208] sm:$0xf]  ;;  %v3428_v44 = vld [vmem:[#allocation2 + $0x2e0] sm:$0xf0] }
  0xd0   :  { %1483 = vmatpush.bf16.msrb.mxu1 %v2676_v48  ;;  %1511 = vmatpush.bf16.msrb.mxu3 %v2684_v49  ;;  %v3402_v48 = vld [vmem:[#allocation2 + $0x214] sm:$0xf]  ;;  %v2933_v49 = vld [vmem:[#allocation2 + $0x2ec] sm:$0xf0]  ;;  %v2924_v51 = vor.u32 %v3428_v44, %v2923_v43  ;;  %v2724_v43 = vor.u32 %v3348_v35, %v2721_v36  ;;  %v1226_v34 = vand.u32 %v3192_v30, %v3785_v13  ;;  %v2979_v35 = vld [vmem:[#allocation2 + $0x240] sm:$0xf] }
  0xd1   :  { %v2936_v55 = vor.u32 %v3402_v48, %v2933_v49  ;;  %v3460_v48 = vld [vmem:[#allocation2 + $0x3e4] sm:$0xf]  ;;  %v3177_v49 = vld [vmem:[#allocation2 + $0x4bc] sm:$0x70]  ;;  %v3435_v36 = vld [vmem:[#allocation2 + $0x318] sm:$0xf0] }
  0xd2   :  { %v2980_v46 = vor.u32 %v3435_v36, %v2979_v35  ;;  %v3381_v30 = vld [vmem:[#allocation2 + $0x168] sm:$0xf0]  ;;  %v3908_v35 = vld [vmem:[%s4360_s2] sm:$0xff] }
  0xd5   :  { %3289 = vmatmul.msk.bf16.vlgmr.msra.gmra.mxu0 %vm1121_vm2, %v3809_v45  ;;  %3290 = vmatmul.msk.bf16.vlgmr.msra.gmra.mxu1 %vm1121_vm2, %v3809_v45 }
  0xd6   :  { %3291 = vmatmul.msk.bf16.vlgmr.msra.gmra.mxu2 %vm1121_vm2, %v3809_v45  ;;  %3292 = vmatmul.msk.bf16.vlgmr.msra.gmra.mxu3 %vm1121_vm2, %v3809_v45 }
  0xd7   :  { %1551 = vmatpush.bf16.msra.mxu2 %v1184_v60  ;;  %1523 = vmatpush.bf16.msra.mxu0 %v1178_v61  ;;  %v3347_v60 = vld [vmem:[#allocation2 + $0x5c] sm:$0xf]  ;;  %v2713_v61 = vld [vmem:[#allocation2 + $0x134] sm:$0xf0] }
  0xd8   :  { %1537 = vmatpush.bf16.msra.mxu1 %v1181_v0  ;;  %1565 = vmatpush.bf16.msra.mxu3 %v1187_v1  ;;  %v3167_v0 = vld [vmem:[#allocation2 + $0x3d8] sm:$0xf]  ;;  %v3486_v1 = vld [vmem:[#allocation2 + $0x4b0] sm:$0x70]  ;;  %v2716_v3 = vor.u32 %v3347_v60, %v2713_v61 }
  0xd9   :  { %v3168_v10 = vor.u32 %v3486_v1, %v3167_v0  ;;  %v3405_v0 = vld [vmem:[#allocation2 + $0x22c] sm:$0xf]  ;;  %v2957_v1 = vld [vmem:[#allocation2 + $0x304] sm:$0xf0] }
  0xdb   :  { %1552 = vmatpush.bf16.msra.mxu2 %v2916_v8  ;;  %1524 = vmatpush.bf16.msra.mxu0 %v2908_v9  ;;  %v3459_v8 = vld [vmem:[#allocation2 + $0x3dc] sm:$0xf]  ;;  %v3169_v9 = vld [vmem:[#allocation2 + $0x4b4] sm:$0x70]  ;;  %v1208_v15 = vand.u32 %v3168_v10, %v3785_v13  ;;  %v2735_v10 = vld [vmem:[#allocation2 + $0x70] sm:$0xf] }
  0xdc   :  { %1538 = vmatpush.bf16.msra.mxu1 %v2912_v12  ;;  %1566 = vmatpush.bf16.msra.mxu3 %v2920_v14  ;;  %v3164_v12 = vor.u32 %v3458_v6, %v3161_v7  ;;  %v3172_v14 = vor.u32 %v3459_v8, %v3169_v9  ;;  %v2743_v6 = vld [vmem:[#allocation2 + $0x78] sm:$0xf]  ;;  %v3378_v7 = vld [vmem:[#allocation2 + $0x150] sm:$0xf0]  ;;  %v2960_v8 = vor.u32 %v3405_v0, %v2957_v1  ;;  %v3207_v0 = vld [vmem:[#allocation2 + $0x400] sm:$0xf] }
  0xdd   :  { %v2744_v17 = vor.u32 %v3378_v7, %v2743_v6  ;;  %v2736_v18 = vor.u32 %v3377_v11, %v2735_v10  ;;  %v3491_v1 = vld [vmem:[#allocation2 + $0x4d8] sm:$0x70] }
  0xde   :  { %v1205_v19 = vand.u32 %v3164_v12, %v3785_v13  ;;  %v1211_v20 = vand.u32 %v3172_v14, %v3785_v13  ;;  %v3350_v12 = vld [vmem:[#allocation2 + $0x74] sm:$0xf]  ;;  %v2737_v14 = vld [vmem:[#allocation2 + $0x14c] sm:$0xf0]  ;;  %v3208_v7 = vor.u32 %v3491_v1, %v3207_v0 }
  0xdf   :  { %1553 = vmatpush.bf16.msra.mxu2 %v2696_v21  ;;  %1525 = vmatpush.bf16.msra.mxu0 %v2688_v22  ;;  %v2939_v21 = vld [vmem:[#allocation2 + $0x218] sm:$0xf]  ;;  %v3430_v22 = vld [vmem:[#allocation2 + $0x2f0] sm:$0xf0] }
  0xe0   :  { %1539 = vmatpush.bf16.msra.mxu1 %v2692_v25  ;;  %1567 = vmatpush.bf16.msra.mxu3 %v2700_v26  ;;  %v3404_v25 = vld [vmem:[#allocation2 + $0x224] sm:$0xf]  ;;  %v2949_v26 = vld [vmem:[#allocation2 + $0x2fc] sm:$0xf0]  ;;  %v2940_v28 = vor.u32 %v3430_v22, %v2939_v21  ;;  %v2740_v21 = vor.u32 %v3350_v12, %v2737_v14  ;;  %v1238_v11 = vand.u32 %v3208_v7, %v3785_v13  ;;  %v2995_v12 = vld [vmem:[#allocation2 + $0x250] sm:$0xf] }
  0xe1   :  { %v2952_v32 = vor.u32 %v3404_v25, %v2949_v26  ;;  %v3462_v25 = vld [vmem:[#allocation2 + $0x3f4] sm:$0xf]  ;;  %v3193_v26 = vld [vmem:[#allocation2 + $0x4cc] sm:$0x70]  ;;  %v3437_v14 = vld [vmem:[#allocation2 + $0x328] sm:$0xf0] }
  0xe2   :  { %v2996_v23 = vor.u32 %v3437_v14, %v2995_v12  ;;  %v3412_v7 = vld [vmem:[#allocation2 + $0x264] sm:$0xf]  ;;  %v2791_v14 = vld [vmem:[#allocation2 + $0xa8] sm:$0xf] }
  0xe5   :  { %3293 = vmatmul.msk.bf16.vlgmr.msrb.gmra.mxu0 %vm1121_vm2, %v3809_v45  ;;  %3294 = vmatmul.msk.bf16.vlgmr.msrb.gmra.mxu1 %vm1121_vm2, %v3809_v45 }
  0xe6   :  { %3295 = vmatmul.msk.bf16.vlgmr.msrb.gmra.mxu2 %vm1121_vm2, %v3809_v45  ;;  %3296 = vmatmul.msk.bf16.vlgmr.msrb.gmra.mxu3 %vm1121_vm2, %v3809_v45 }
  0xe7   :  { %1607 = vmatpush.bf16.msrb.mxu2 %v1196_v37  ;;  %1579 = vmatpush.bf16.msrb.mxu0 %v1190_v38  ;;  %v3349_v37 = vld [vmem:[#allocation2 + $0x6c] sm:$0xf]  ;;  %v2729_v38 = vld [vmem:[#allocation2 + $0x144] sm:$0xf0] }
  0xe8   :  { %1593 = vmatpush.bf16.msrb.mxu1 %v1193_v41  ;;  %1621 = vmatpush.bf16.msrb.mxu3 %v1199_v42  ;;  %v3183_v41 = vld [vmem:[#allocation2 + $0x3e8] sm:$0xf]  ;;  %v3488_v42 = vld [vmem:[#allocation2 + $0x4c0] sm:$0x70]  ;;  %v2732_v44 = vor.u32 %v3349_v37, %v2729_v38 }
  0xe9   :  { %v3184_v52 = vor.u32 %v3488_v42, %v3183_v41  ;;  %v3407_v41 = vld [vmem:[#allocation2 + $0x23c] sm:$0xf]  ;;  %v2973_v42 = vld [vmem:[#allocation2 + $0x314] sm:$0xf0] }
  0xeb   :  { %1608 = vmatpush.bf16.msrb.mxu2 %v2932_v50  ;;  %1580 = vmatpush.bf16.msrb.mxu0 %v2924_v51  ;;  %v3461_v50 = vld [vmem:[#allocation2 + $0x3ec] sm:$0xf]  ;;  %v3185_v51 = vld [vmem:[#allocation2 + $0x4c4] sm:$0x70]  ;;  %v1220_v56 = vand.u32 %v3184_v52, %v3785_v13  ;;  %v2751_v52 = vld [vmem:[#allocation2 + $0x80] sm:$0xf] }
  0xec   :  { %1594 = vmatpush.bf16.msrb.mxu1 %v2928_v54  ;;  %1622 = vmatpush.bf16.msrb.mxu3 %v2936_v55  ;;  %v3180_v54 = vor.u32 %v3460_v48, %v3177_v49  ;;  %v3188_v55 = vor.u32 %v3461_v50, %v3185_v51  ;;  %v2759_v48 = vld [vmem:[#allocation2 + $0x88] sm:$0xf]  ;;  %v3380_v49 = vld [vmem:[#allocation2 + $0x160] sm:$0xf0]  ;;  %v2976_v50 = vor.u32 %v3407_v41, %v2973_v42  ;;  %v3223_v42 = vld [vmem:[#allocation2 + $0x410] sm:$0xf] }
  0xed   :  { %v2760_v58 = vor.u32 %v3380_v49, %v2759_v48  ;;  %v2752_v59 = vor.u32 %v3379_v53, %v2751_v52  ;;  %v3233_v48 = vld [vmem:[#allocation2 + $0x4f4] sm:$0x70]  ;;  %v222_v49 = vperm.slane %v3908_v35, 0 }
  0xee   :  { %v1217_v60 = vand.u32 %v3180_v54, %v3785_v13  ;;  %v1223_v61 = vand.u32 %v3188_v55, %v3785_v13  ;;  %v3352_v54 = vld [vmem:[#allocation2 + $0x84] sm:$0xf]  ;;  %v2753_v55 = vld [vmem:[#allocation2 + $0x15c] sm:$0xf0] }
  0xef   :  { %1609 = vmatpush.bf16.msrb.mxu2 %v2712_v62  ;;  %1581 = vmatpush.bf16.msrb.mxu0 %v2704_v63  ;;  %v2955_v62 = vld [vmem:[#allocation2 + $0x228] sm:$0xf]  ;;  %v3432_v63 = vld [vmem:[#allocation2 + $0x300] sm:$0xf0] }
  0xf0   :  { %1595 = vmatpush.bf16.msrb.mxu1 %v2708_v2  ;;  %1623 = vmatpush.bf16.msrb.mxu3 %v2716_v3  ;;  %v3406_v2 = vld [vmem:[#allocation2 + $0x234] sm:$0xf]  ;;  %v2965_v3 = vld [vmem:[#allocation2 + $0x30c] sm:$0xf0]  ;;  %v2956_v5 = vor.u32 %v3432_v63, %v2955_v62  ;;  %v2756_v62 = vor.u32 %v3352_v54, %v2753_v55 }
  0xf1   :  { %v2968_v9 = vor.u32 %v3406_v2, %v2965_v3  ;;  %v3464_v2 = vld [vmem:[#allocation2 + $0x404] sm:$0xf]  ;;  %v3209_v3 = vld [vmem:[#allocation2 + $0x4dc] sm:$0x70] }
  0xf5   :  { %3297 = vmatmul.msk.bf16.vlgmr.msra.gmra.mxu0 %vm1121_vm2, %v3809_v45  ;;  %3298 = vmatmul.msk.bf16.vlgmr.msra.gmra.mxu1 %vm1121_vm2, %v3809_v45 }
  0xf6   :  { %3299 = vmatmul.msk.bf16.vlgmr.msra.gmra.mxu2 %vm1121_vm2, %v3809_v45  ;;  %3300 = vmatmul.msk.bf16.vlgmr.msra.gmra.mxu3 %vm1121_vm2, %v3809_v45 }
  0xf7   :  { %1663 = vmatpush.bf16.msra.mxu2 %v1208_v15  ;;  %1635 = vmatpush.bf16.msra.mxu0 %v1202_v16  ;;  %v3351_v15 = vld [vmem:[#allocation2 + $0x7c] sm:$0xf]  ;;  %v2745_v16 = vld [vmem:[#allocation2 + $0x154] sm:$0xf0] }
  0xf8   :  { %1649 = vmatpush.bf16.msra.mxu1 %v1205_v19  ;;  %1677 = vmatpush.bf16.msra.mxu3 %v1211_v20  ;;  %v3199_v19 = vld [vmem:[#allocation2 + $0x3f8] sm:$0xf]  ;;  %v3490_v20 = vld [vmem:[#allocation2 + $0x4d0] sm:$0x70]  ;;  %v2748_v22 = vor.u32 %v3351_v15, %v2745_v16 }
  0xf9   :  { %v3200_v29 = vor.u32 %v3490_v20, %v3199_v19  ;;  %v3409_v19 = vld [vmem:[#allocation2 + $0x24c] sm:$0xf]  ;;  %v2989_v20 = vld [vmem:[#allocation2 + $0x324] sm:$0xf0] }
  0xfb   :  { %1664 = vmatpush.bf16.msra.mxu2 %v2948_v27  ;;  %1636 = vmatpush.bf16.msra.mxu0 %v2940_v28  ;;  %v3463_v27 = vld [vmem:[#allocation2 + $0x3fc] sm:$0xf]  ;;  %v3201_v28 = vld [vmem:[#allocation2 + $0x4d4] sm:$0x70]  ;;  %v1232_v33 = vand.u32 %v3200_v29, %v3785_v13  ;;  %v2767_v29 = vld [vmem:[#allocation2 + $0x90] sm:$0xf] }
  0xfc   :  { %1650 = vmatpush.bf16.msra.mxu1 %v2944_v31  ;;  %1678 = vmatpush.bf16.msra.mxu3 %v2952_v32  ;;  %v3196_v31 = vor.u32 %v3462_v25, %v3193_v26  ;;  %v3204_v32 = vor.u32 %v3463_v27, %v3201_v28  ;;  %v2775_v25 = vld [vmem:[#allocation2 + $0x98] sm:$0xf]  ;;  %v3382_v26 = vld [vmem:[#allocation2 + $0x170] sm:$0xf0]  ;;  %v2992_v27 = vor.u32 %v3409_v19, %v2989_v20  ;;  %v3383_v19 = vld [vmem:[#allocation2 + $0x178] sm:$0xf0] }
  0xfd   :  { %v2776_v36 = vor.u32 %v3382_v26, %v2775_v25  ;;  %v3356_v20 = vld [vmem:[#allocation2 + $0xa4] sm:$0xf]  ;;  %v2793_v25 = vld [vmem:[#allocation2 + $0x184] sm:$0xf0] }
  0xfe   :  { %v1229_v37 = vand.u32 %v3196_v31, %v3785_v13  ;;  %v1235_v38 = vand.u32 %v3204_v32, %v3785_v13  ;;  %v3354_v31 = vld [vmem:[#allocation2 + $0x94] sm:$0xf]  ;;  %v2769_v32 = vld [vmem:[#allocation2 + $0x16c] sm:$0xf0] }
  0xff   :  { %1665 = vmatpush.bf16.msra.mxu2 %v2728_v39  ;;  %1637 = vmatpush.bf16.msra.mxu0 %v2720_v40  ;;  %v2971_v39 = vld [vmem:[#allocation2 + $0x238] sm:$0xf]  ;;  %v3434_v40 = vld [vmem:[#allocation2 + $0x310] sm:$0xf0] }
 0x100   :  { %1651 = vmatpush.bf16.msra.mxu1 %v2724_v43  ;;  %1679 = vmatpush.bf16.msra.mxu3 %v2732_v44  ;;  %v3408_v43 = vld [vmem:[#allocation2 + $0x244] sm:$0xf]  ;;  %v2981_v44 = vld [vmem:[#allocation2 + $0x31c] sm:$0xf0]  ;;  %v2972_v47 = vor.u32 %v3434_v40, %v2971_v39  ;;  %v3494_v39 = vld [vmem:[#allocation2 + $0x4f0] sm:$0x70]  ;;  %v2772_v40 = vor.u32 %v3354_v31, %v2769_v32 }
 0x101   :  { %v2984_v51 = vor.u32 %v3408_v43, %v2981_v44  ;;  %v3493_v43 = vld [vmem:[#allocation2 + $0x4e8] sm:$0x70]  ;;  %v3466_v44 = vld [vmem:[#allocation2 + $0x414] sm:$0xf]  ;;  %v3247_v31 = vld [vmem:[#allocation2 + $0x428] sm:$0xf] }
 0x102   :  { %v3224_v52 = vor.u32 %v3493_v43, %v3223_v42  ;;  %v3468_v43 = vld [vmem:[#allocation2 + $0x424] sm:$0xf] }
 0x105   :  { %3301 = vmatmul.msk.bf16.vlgmr.msrb.gmra.mxu0 %vm1121_vm2, %v3809_v45  ;;  %3302 = vmatmul.msk.bf16.vlgmr.msrb.gmra.mxu1 %vm1121_vm2, %v3809_v45 }
 0x106   :  { %3303 = vmatmul.msk.bf16.vlgmr.msrb.gmra.mxu2 %vm1121_vm2, %v3809_v45  ;;  %3304 = vmatmul.msk.bf16.vlgmr.msrb.gmra.mxu3 %vm1121_vm2, %v3809_v45 }
 0x107   :  { %1719 = vmatpush.bf16.msrb.mxu2 %v1220_v56  ;;  %1691 = vmatpush.bf16.msrb.mxu0 %v1214_v57  ;;  %v3353_v56 = vld [vmem:[#allocation2 + $0x8c] sm:$0xf]  ;;  %v2761_v57 = vld [vmem:[#allocation2 + $0x164] sm:$0xf0] }
 0x108   :  { %1705 = vmatpush.bf16.msrb.mxu1 %v1217_v60  ;;  %1733 = vmatpush.bf16.msrb.mxu3 %v1223_v61  ;;  %v3215_v60 = vld [vmem:[#allocation2 + $0x408] sm:$0xf]  ;;  %v3492_v61 = vld [vmem:[#allocation2 + $0x4e0] sm:$0x70]  ;;  %v2764_v63 = vor.u32 %v3353_v56, %v2761_v57 }
 0x109   :  { %v3216_v6 = vor.u32 %v3492_v61, %v3215_v60  ;;  %v1250_v60 = vand.u32 %v3224_v52, %v3785_v13  ;;  %v3011_v61 = vld [vmem:[#allocation2 + $0x260] sm:$0xf] }
 0x10b   :  { %1720 = vmatpush.bf16.msrb.mxu2 %v2964_v4  ;;  %1692 = vmatpush.bf16.msrb.mxu0 %v2956_v5  ;;  %v3465_v4 = vld [vmem:[#allocation2 + $0x40c] sm:$0xf]  ;;  %v3217_v5 = vld [vmem:[#allocation2 + $0x4e4] sm:$0x70]  ;;  %v1244_v10 = vand.u32 %v3216_v6, %v3785_v13 }
 0x10c   :  { %1706 = vmatpush.bf16.msrb.mxu1 %v2960_v8  ;;  %1734 = vmatpush.bf16.msrb.mxu3 %v2968_v9  ;;  %v3212_v8 = vor.u32 %v3464_v2, %v3209_v3  ;;  %v3220_v9 = vor.u32 %v3465_v4, %v3217_v5  ;;  %v3438_v2 = vld [vmem:[#allocation2 + $0x330] sm:$0xf0]  ;;  %v3411_v3 = vld [vmem:[#allocation2 + $0x25c] sm:$0xf]  ;;  %v3005_v4 = vld [vmem:[#allocation2 + $0x334] sm:$0xf0] }
 0x10e   :  { %v1241_v15 = vand.u32 %v3212_v8, %v3785_v13  ;;  %v1247_v16 = vand.u32 %v3220_v9, %v3785_v13  ;;  %v3013_v8 = vld [vmem:[#allocation2 + $0x33c] sm:$0xf0]  ;;  %v224_v9 = vperm.slane %v3908_v35, 2 }
 0x10f   :  { %1721 = vmatpush.bf16.msrb.mxu2 %v2744_v17  ;;  %1693 = vmatpush.bf16.msrb.mxu0 %v2736_v18  ;;  %v2987_v17 = vld [vmem:[#allocation2 + $0x248] sm:$0xf]  ;;  %v3436_v18 = vld [vmem:[#allocation2 + $0x320] sm:$0xf0] }
 0x110   :  { %1707 = vmatpush.bf16.msrb.mxu1 %v2740_v21  ;;  %1735 = vmatpush.bf16.msrb.mxu3 %v2748_v22  ;;  %v3410_v21 = vld [vmem:[#allocation2 + $0x254] sm:$0xf]  ;;  %v2997_v22 = vld [vmem:[#allocation2 + $0x32c] sm:$0xf0]  ;;  %v2988_v24 = vor.u32 %v3436_v18, %v2987_v17  ;;  %v3016_v17 = vor.u32 %v3412_v7, %v3013_v8  ;;  %v2783_v18 = vld [vmem:[#allocation2 + $0xa0] sm:$0xf] }
 0x111   :  { %v3000_v28 = vor.u32 %v3410_v21, %v2997_v22 }
 0x115   :  { %3305 = vmatmul.msk.bf16.vlgmr.msra.gmra.mxu0 %vm1121_vm2, %v3809_v45  ;;  %3306 = vmatmul.msk.bf16.vlgmr.msra.gmra.mxu1 %vm1121_vm2, %v3809_v45 }
 0x116   :  { %3307 = vmatmul.msk.bf16.vlgmr.msra.gmra.mxu2 %vm1121_vm2, %v3809_v45  ;;  %3308 = vmatmul.msk.bf16.vlgmr.msra.gmra.mxu3 %vm1121_vm2, %v3809_v45 }
 0x117   :  { %1775 = vmatpush.bf16.msra.mxu2 %v1232_v33  ;;  %1747 = vmatpush.bf16.msra.mxu0 %v1226_v34  ;;  %v3355_v33 = vld [vmem:[#allocation2 + $0x9c] sm:$0xf]  ;;  %v2777_v34 = vld [vmem:[#allocation2 + $0x174] sm:$0xf0] }
 0x118   :  { %1761 = vmatpush.bf16.msra.mxu1 %v1229_v37  ;;  %1789 = vmatpush.bf16.msra.mxu3 %v1235_v38  ;;  %v2768_v37 = vor.u32 %v3381_v30, %v2767_v29  ;;  %v3231_v38 = vld [vmem:[#allocation2 + $0x418] sm:$0xf]  ;;  %v2780_v41 = vor.u32 %v3355_v33, %v2777_v34  ;;  %v2784_v34 = vor.u32 %v3383_v19, %v2783_v18  ;;  %v3959_v18 = vld [vmem:[#allocation2 + $0x344] sm:$0xf0]  ;;  %v3961_v19 = vld [vmem:[#allocation2 + $0x274] sm:$0xf] }
 0x11b   :  { %1776 = vmatpush.bf16.msra.mxu2 %v2980_v46  ;;  %1748 = vmatpush.bf16.msra.mxu0 %v2972_v47  ;;  %v3225_v46 = vld [vmem:[#allocation2 + $0x4ec] sm:$0x70]  ;;  %v3467_v47 = vld [vmem:[#allocation2 + $0x41c] sm:$0xf] }
 0x11c   :  { %1762 = vmatpush.bf16.msra.mxu1 %v2976_v50  ;;  %1790 = vmatpush.bf16.msra.mxu3 %v2984_v51  ;;  %v223_v50 = vperm.slane %v3908_v35, 1  ;;  %v3232_v51 = vor.u32 %v3494_v39, %v3231_v38  ;;  %v3228_v53 = vor.u32 %v3466_v44, %v3225_v46  ;;  %v3236_v54 = vor.u32 %v3467_v47, %v3233_v48  ;;  %v3495_v38 = vld [vmem:[#allocation2 + $0x4f8] sm:$0x70]  ;;  %v3241_v44 = vld [vmem:[#allocation2 + $0x4fc] sm:$0x70] }
 0x11e   :  { %v1253_v0 = vand.u32 %v3228_v53, %v3785_v13  ;;  %v1259_v1 = vand.u32 %v3236_v54, %v3785_v13  ;;  %v226_v53 = vperm.slane %v3908_v35, 4 }
 0x11f   :  { %1777 = vmatpush.bf16.msra.mxu2 %v2760_v58  ;;  %1749 = vmatpush.bf16.msra.mxu0 %v2752_v59  ;;  %v1256_v59 = vand.u32 %v3232_v51, %v3785_v13  ;;  %v3469_v51 = vld [vmem:[#allocation2 + $0x42c] sm:$0xf] }
 0x120   :  { %1763 = vmatpush.bf16.msra.mxu1 %v2756_v62  ;;  %1791 = vmatpush.bf16.msra.mxu3 %v2764_v63  ;;  %v3439_v62 = vld [vmem:[#allocation2 + $0x338] sm:$0xf0]  ;;  %v3003_v63 = vld [vmem:[#allocation2 + $0x258] sm:$0xf] }
 0x121   :  { %v3004_v12 = vor.u32 %v3438_v2, %v3003_v63  ;;  %v3937_v2 = vld [vmem:[%s4360_s2 + $0x8] sm:$0xff] }
 0x125   :  { %3309 = vmatmul.msk.bf16.vlgmr.msrb.gmra.mxu0 %vm1121_vm2, %v3809_v45  ;;  %3310 = vmatmul.msk.bf16.vlgmr.msrb.gmra.mxu1 %vm1121_vm2, %v3809_v45 }
 0x126   :  { %3311 = vmatmul.msk.bf16.vlgmr.msrb.gmra.mxu2 %vm1121_vm2, %v3809_v45  ;;  %3312 = vmatmul.msk.bf16.vlgmr.msrb.gmra.mxu3 %vm1121_vm2, %v3809_v45 }
 0x127   :  { %1831 = vmatpush.bf16.msrb.mxu2 %v1244_v10  ;;  %1803 = vmatpush.bf16.msrb.mxu0 %v1238_v11  ;;  %v225_v10 = vperm.slane %v3908_v35, 3  ;;  %v3012_v11 = vor.u32 %v3439_v62, %v3011_v61 }
 0x128   :  { %1817 = vmatpush.bf16.msrb.mxu1 %v1241_v15  ;;  %1845 = vmatpush.bf16.msrb.mxu3 %v1247_v16  ;;  %v3384_v15 = vld [vmem:[#allocation2 + $0x180] sm:$0xf0]  ;;  %v3008_v16 = vor.u32 %v3411_v3, %v3005_v4  ;;  %v3939_v3 = vld [vmem:[#allocation2 + $0x270] sm:$0xf] }
 0x129   :  { %v2792_v30 = vor.u32 %v3384_v15, %v2791_v14  ;;  %v3950_v14 = vld [vmem:[#allocation2 + $0x340] sm:$0xf0] }
 0x12b   :  { %1832 = vmatpush.bf16.msrb.mxu2 %v2996_v23  ;;  %1804 = vmatpush.bf16.msrb.mxu0 %v2988_v24  ;;  %v2785_v23 = vld [vmem:[#allocation2 + $0x17c] sm:$0xf0]  ;;  %v3357_v24 = vld [vmem:[#allocation2 + $0xac] sm:$0xf] }
 0x12c   :  { %1818 = vmatpush.bf16.msrb.mxu1 %v2992_v27  ;;  %1846 = vmatpush.bf16.msrb.mxu3 %v3000_v28  ;;  %v2796_v42 = vor.u32 %v3357_v24, %v2793_v25  ;;  %v3965_v25 = vld [vmem:[#allocation2 + $0x34c] sm:$0xf0] }
 0x12f   :  { %1833 = vmatpush.bf16.msrb.mxu2 %v2776_v36  ;;  %1805 = vmatpush.bf16.msrb.mxu0 %v2768_v37  ;;  %v3496_v36 = vld [vmem:[#allocation2 + $0x500] sm:$0x70]  ;;  %v3239_v37 = vld [vmem:[#allocation2 + $0x420] sm:$0xf] }
 0x130   :  { %1819 = vmatpush.bf16.msrb.mxu1 %v2772_v40  ;;  %1847 = vmatpush.bf16.msrb.mxu3 %v2780_v41  ;;  %v2788_v41 = vor.u32 %v3356_v20, %v2785_v23  ;;  %v3248_v54 = vor.u32 %v3496_v36, %v3247_v31  ;;  %v230_v31 = vperm.slane %v3937_v2, 0 }
 0x132   :  { %v1303_v55 = vpop.f32.mrf.mxu0  ;;  %v1317_v56 = vpop.f32.mrf.mxu1  ;;  %v1268_v8 = vand.u32 %v3248_v54, %v3785_v13 }
 0x133   :  { %v1304_v57 = vadd.f32 %v1303_v55, %v222_v49  ;;  %v1318_v58 = vadd.f32 %v1317_v56, %v223_v50  ;;  %v227_v56 = vperm.slane %v3908_v35, 5 }
 0x135   :  { %v2064_v5 = vmul.f32 0.5, %v1304_v57  ;;  %v2065_v6 = vmul.f32 0.5, %v1318_v58  ;;  %3313 = vmatmul.msk.bf16.vlgmr.msra.gmra.mxu0 %vm1121_vm2, %v3809_v45  ;;  %3314 = vmatmul.msk.bf16.vlgmr.msra.gmra.mxu1 %vm1121_vm2, %v3809_v45  ;;  %v3240_v57 = vor.u32 %v3495_v38, %v3239_v37  ;;  %v3987_v38 = vld [vmem:[#allocation2 + $0xb0] sm:$0xf] }
 0x136   :  { %3315 = vmatmul.msk.bf16.vlgmr.msra.gmra.mxu2 %vm1121_vm2, %v3809_v45  ;;  %3316 = vmatmul.msk.bf16.vlgmr.msra.gmra.mxu3 %vm1121_vm2, %v3809_v45 }
 0x137   :  { %3506 = vtanh.f32 %v2064_v5  ;;  %1887 = vmatpush.bf16.msra.mxu2 %v1256_v59  ;;  %1859 = vmatpush.bf16.msra.mxu0 %v1250_v60  ;;  %v3244_v59 = vor.u32 %v3468_v43, %v3241_v44  ;;  %v3993_v44 = vld [vmem:[#allocation2 + $0xb4] sm:$0xf] }
 0x138   :  { %3508 = vtanh.f32 %v2065_v6  ;;  %1873 = vmatpush.bf16.msra.mxu1 %v1253_v0  ;;  %1901 = vmatpush.bf16.msra.mxu3 %v1259_v1  ;;  %v228_v0 = vperm.slane %v3908_v35, 6  ;;  %v229_v1 = vperm.slane %v3908_v35, 7  ;;  %v4044_v35 = vld [vmem:[#allocation2 + $0x284] sm:$0xf] }
 0x139   :  { %v1331_v21 = vpop.f32.mrf.mxu2  ;;  %v1345_v22 = vpop.f32.mrf.mxu3  ;;  %v1265_v23 = vand.u32 %v3244_v59, %v3785_v13  ;;  %v3263_v59 = vld [vmem:[#allocation2 + $0x438] sm:$0xf] }
 0x13a   :  { %v1332_v26 = vadd.f32 %v1331_v21, %v224_v9  ;;  %v1346_v27 = vadd.f32 %v1345_v22, %v225_v10  ;;  %v1305_v28 = vpop.f32.mrf.mxu0  ;;  %v1319_v29 = vpop.f32.mrf.mxu1 }
 0x13b   :  { %v1306_v32 = vadd.f32 %v1305_v28, %v222_v49  ;;  %v1320_v33 = vadd.f32 %v1319_v29, %v223_v50  ;;  %1888 = vmatpush.bf16.msra.mxu2 %v3012_v11  ;;  %1860 = vmatpush.bf16.msra.mxu0 %v3004_v12  ;;  %v3249_v49 = vld [vmem:[#allocation2 + $0x504] sm:$0x70]  ;;  %v3946_v11 = vld [vmem:[#allocation2 + $0x348] sm:$0xf0] }
 0x13c   :  { %v2066_v39 = vmul.f32 0.5, %v1332_v26  ;;  %v2067_v40 = vmul.f32 0.5, %v1346_v27  ;;  %1874 = vmatpush.bf16.msra.mxu1 %v3008_v16  ;;  %1902 = vmatpush.bf16.msra.mxu3 %v3016_v17  ;;  %v3252_v60 = vor.u32 %v3469_v51, %v3249_v49  ;;  %v3948_v12 = vld [vmem:[#allocation2 + $0x268] sm:$0xf]  ;;  %v1262_v17 = vand.u32 %v3240_v57, %v3785_v13  ;;  %v3967_v26 = vld [vmem:[#allocation2 + $0xb8] sm:$0xf] }
 0x13d   :  { %v3507_v46 = vpop.eup %3506  ;;  %v2119_v47 = vmul.f32 0.5, %v1306_v32  ;;  %v2120_v48 = vmul.f32 0.5, %v1320_v33  ;;  %v3977_v32 = vld [vmem:[#allocation2 + $0x190] sm:$0xf0]  ;;  %v3028_v36 = vor.u32 %v3946_v11, %v3939_v3  ;;  %v3020_v37 = vor.u32 %v3950_v14, %v3948_v12  ;;  %v2801_v51 = vld [vmem:[#allocation2 + $0x18c] sm:$0xf0] }
 0x13e   :  { %v3509_v50 = vpop.eup %3508  ;;  %v2284_v52 = vmul.f32 0.5, %v3507_v46  ;;  %3510 = vtanh.f32 %v2066_v39  ;;  %v1271_v24 = vand.u32 %v3252_v60, %v3785_v13  ;;  %v3989_v39 = vld [vmem:[#allocation2 + $0x188] sm:$0xf0]  ;;  %v3359_v49 = vld [vmem:[#allocation2 + $0xbc] sm:$0xf]  ;;  %v2804_v11 = vor.u32 %v3993_v44, %v2801_v51 }
 0x13f   :  { %v2285_v55 = vmul.f32 0.5, %v3509_v50  ;;  %3512 = vtanh.f32 %v2067_v40  ;;  %1889 = vmatpush.bf16.msra.mxu2 %v2792_v30  ;;  %1861 = vmatpush.bf16.msra.mxu0 %v2784_v34  ;;  %v2800_v57 = vor.u32 %v3989_v39, %v3987_v38  ;;  %v3497_v12 = vld [vmem:[#allocation2 + $0x508] sm:$0x70]  ;;  %v3470_v14 = vld [vmem:[#allocation2 + $0x434] sm:$0xf] }
 0x140   :  { %v2394_v58 = vadd.f32 0.5, %v2284_v52  ;;  %3514 = vtanh.f32 %v2119_v47  ;;  %1875 = vmatpush.bf16.msra.mxu1 %v2788_v41  ;;  %1903 = vmatpush.bf16.msra.mxu3 %v2796_v42  ;;  %v4026_v44 = vld [vmem:[#allocation2 + $0x278] sm:$0xf] }
 0x141   :  { %v2395_v61 = vadd.f32 0.5, %v2285_v55  ;;  %3516 = vtanh.f32 %v2120_v48  ;;  %v1333_v62 = vpop.f32.mrf.mxu2  ;;  %v1347_v63 = vpop.f32.mrf.mxu3  ;;  %v3032_v48 = vor.u32 %v3961_v19, %v3965_v25  ;;  %v2808_v55 = vor.u32 %v3977_v32, %v3967_v26 }
 0x142   :  { %v1334_v4 = vadd.f32 %v1333_v62, %v224_v9  ;;  %v1348_v5 = vadd.f32 %v1347_v63, %v225_v10  ;;  %v1359_v6 = vpop.f32.mrf.mxu0  ;;  %v1373_v7 = vpop.f32.mrf.mxu1  ;;  %v3957_v10 = vld [vmem:[#allocation2 + $0x26c] sm:$0xf]  ;;  %v231_v26 = vperm.slane %v3937_v2, 1 }
 0x143   :  { %v2504_v15 = vpack.c.bf16 %v2395_v61, %v2394_v58  ;;  %v1360_v16 = vadd.f32 %v1359_v6, %v226_v53  ;;  %v1374_v9 = vadd.f32 %v1373_v7, %v227_v56  ;;  %v3024_v43 = vor.u32 %v3957_v10, %v3959_v18  ;;  %v2809_v58 = vld [vmem:[#allocation2 + $0x194] sm:$0xf0]  ;;  %v4005_v6 = vld [vmem:[#allocation2 + $0x430] sm:$0xf]  ;;  %v3471_v18 = vld [vmem:[#allocation2 + $0x43c] sm:$0xf] }
 0x144   :  { %v3511_v20 = vpop.eup %3510  ;;  %v2121_v21 = vmul.f32 0.5, %v1334_v4  ;;  %v2122_v22 = vmul.f32 0.5, %v1348_v5  ;;  %v3498_v5 = vld [vmem:[#allocation2 + $0x510] sm:$0x70] }
 0x145   :  { %v3513_v27 = vpop.eup %3512  ;;  %2560 = vst [vmem:[%s4361_s3] sm:$0xff] %v2504_v15  ;;  %v2286_v28 = vmul.f32 0.5, %v3511_v20  ;;  %v2068_v29 = vmul.f32 0.5, %v1360_v16  ;;  %v2069_v30 = vmul.f32 0.5, %v1374_v9  ;;  %3317 = vmatmul.msk.bf16.vlgmr.msrb.gmra.mxu0 %vm1121_vm2, %v3809_v45  ;;  %3318 = vmatmul.msk.bf16.vlgmr.msrb.gmra.mxu1 %vm1121_vm2, %v3809_v45  ;;  %v3257_v15 = vld [vmem:[#allocation2 + $0x50c] sm:$0x70] }
 0x146   :  { %v3515_v33 = vpop.eup %3514  ;;  %v2287_v34 = vmul.f32 0.5, %v3513_v27  ;;  %3518 = vtanh.f32 %v2121_v21  ;;  %3319 = vmatmul.msk.bf16.vlgmr.msrb.gmra.mxu2 %vm1121_vm2, %v3809_v45  ;;  %3320 = vmatmul.msk.bf16.vlgmr.msrb.gmra.mxu3 %vm1121_vm2, %v3809_v45  ;;  %v3256_v27 = vor.u32 %v3497_v12, %v4005_v6  ;;  %v3260_v32 = vor.u32 %v3470_v14, %v3257_v15  ;;  %v4059_v12 = vld [vmem:[#allocation2 + $0x1a0] sm:$0xf0] }
 0x147   :  { %v3517_v40 = vpop.eup %3516  ;;  %v2396_v41 = vadd.f32 0.5, %v2286_v28  ;;  %v2339_v42 = vmul.f32 0.5, %v3515_v33  ;;  %3520 = vtanh.f32 %v2122_v22  ;;  %1943 = vmatpush.bf16.msrb.mxu2 %v1268_v8  ;;  %1915 = vmatpush.bf16.msrb.mxu0 %v1262_v17  ;;  %v3264_v22 = vor.u32 %v3498_v5, %v3263_v59 }
 0x148   :  { %v2397_v46 = vadd.f32 0.5, %v2287_v34  ;;  %v2340_v47 = vmul.f32 0.5, %v3517_v40  ;;  %3522 = vtanh.f32 %v2068_v29  ;;  %1929 = vmatpush.bf16.msrb.mxu1 %v1265_v23  ;;  %1957 = vmatpush.bf16.msrb.mxu3 %v1271_v24  ;;  %v3265_v23 = vld [vmem:[#allocation2 + $0x514] sm:$0x70]  ;;  %v232_v40 = vperm.slane %v3937_v2, 2 }
 0x149   :  { %v2449_v50 = vadd.f32 0.5, %v2339_v42  ;;  %3524 = vtanh.f32 %v2069_v30  ;;  %v1387_v52 = vpop.f32.mrf.mxu2  ;;  %v1401_v54 = vpop.f32.mrf.mxu3  ;;  %v4022_v42 = vld [vmem:[#allocation2 + $0x280] sm:$0xf]  ;;  %v1277_v59 = vand.u32 %v3260_v32, %v3785_v13  ;;  %v3361_v32 = vld [vmem:[#allocation2 + $0xcc] sm:$0xf] }
 0x14a   :  { %v2505_v60 = vpack.c.bf16 %v2397_v46, %v2396_v41  ;;  %v2450_v61 = vadd.f32 0.5, %v2340_v47  ;;  %v1388_v62 = vadd.f32 %v1387_v52, %v228_v0  ;;  %v1402_v63 = vadd.f32 %v1401_v54, %v229_v1  ;;  %v1361_v3 = vpop.f32.mrf.mxu0  ;;  %v1375_v4 = vpop.f32.mrf.mxu1  ;;  %v4032_v52 = vld [vmem:[#allocation2 + $0x350] sm:$0xf0]  ;;  %v4034_v54 = vld [vmem:[#allocation2 + $0x27c] sm:$0xf] }
 0x14b   :  { %v1362_v7 = vadd.f32 %v1361_v3, %v226_v53  ;;  %v1376_v8 = vadd.f32 %v1375_v4, %v227_v56  ;;  %1944 = vmatpush.bf16.msrb.mxu2 %v3028_v36  ;;  %1916 = vmatpush.bf16.msrb.mxu0 %v3020_v37  ;;  %v2812_v53 = vor.u32 %v3359_v49, %v2809_v58  ;;  %v4052_v4 = vld [vmem:[#allocation2 + $0xc8] sm:$0xf] }
 0x14c   :  { %v3519_v16 = vpop.eup %3518  ;;  %2561 = vst [vmem:[%s4361_s3 + $0x8] sm:$0xff] %v2505_v60  ;;  %v2532_v9 = vpack.c.bf16 %v2450_v61, %v2449_v50  ;;  %v2070_v17 = vmul.f32 0.5, %v1388_v62  ;;  %v2071_v10 = vmul.f32 0.5, %v1402_v63  ;;  %1930 = vmatpush.bf16.msrb.mxu1 %v3024_v43  ;;  %1958 = vmatpush.bf16.msrb.mxu3 %v3032_v48  ;;  %v3268_v36 = vor.u32 %v3471_v18, %v3265_v23  ;;  %v4024_v43 = vld [vmem:[#allocation2 + $0x358] sm:$0xf0] }
 0x14d   :  { %v3521_v56 = vpop.eup %3520  ;;  %v2341_v19 = vmul.f32 0.5, %v3519_v16  ;;  %v2123_v20 = vmul.f32 0.5, %v1362_v7  ;;  %v2124_v21 = vmul.f32 0.5, %v1376_v8  ;;  %v1280_v41 = vand.u32 %v3264_v22, %v3785_v13  ;;  %v3360_v23 = vld [vmem:[#allocation2 + $0xc4] sm:$0xf] }
 0x14e   :  { %v3523_v24 = vpop.eup %3522  ;;  %2588 = vst [vmem:[%s4361_s3 + $0xdc] sm:$0xff] %v2532_v9  ;;  %v2342_v25 = vmul.f32 0.5, %v3521_v56  ;;  %3526 = vtanh.f32 %v2070_v17  ;;  %v1274_v58 = vand.u32 %v3256_v27, %v3785_v13  ;;  %v1283_v3 = vand.u32 %v3268_v36, %v3785_v13  ;;  %v4072_v17 = vld [vmem:[#allocation2 + $0xc0] sm:$0xf] }
 0x14f   :  { %v3525_v28 = vpop.eup %3524  ;;  %v2451_v29 = vadd.f32 0.5, %v2341_v19  ;;  %v2288_v30 = vmul.f32 0.5, %v3523_v24  ;;  %3528 = vtanh.f32 %v2071_v10  ;;  %1945 = vmatpush.bf16.msrb.mxu2 %v2808_v55  ;;  %1917 = vmatpush.bf16.msrb.mxu0 %v2800_v57  ;;  %v3044_v16 = vor.u32 %v4024_v43, %v4022_v42  ;;  %v4074_v10 = vld [vmem:[#allocation2 + $0x198] sm:$0xf0]  ;;  %v2817_v24 = vld [vmem:[#allocation2 + $0x19c] sm:$0xf0] }
 0x150   :  { %v2452_v33 = vadd.f32 0.5, %v2342_v25  ;;  %v2289_v34 = vmul.f32 0.5, %v3525_v28  ;;  %3530 = vtanh.f32 %v2123_v20  ;;  %1931 = vmatpush.bf16.msrb.mxu1 %v2804_v11  ;;  %1959 = vmatpush.bf16.msrb.mxu3 %v2812_v53  ;;  %v233_v11 = vperm.slane %v3937_v2, 3  ;;  %v3279_v42 = vld [vmem:[#allocation2 + $0x448] sm:$0xf] }
 0x151   :  { %v2398_v37 = vadd.f32 0.5, %v2288_v30  ;;  %3532 = vtanh.f32 %v2124_v21  ;;  %v1389_v38 = vpop.f32.mrf.mxu2  ;;  %v1403_v39 = vpop.f32.mrf.mxu3  ;;  %v3036_v9 = vor.u32 %v4032_v52, %v4026_v44  ;;  %v2816_v30 = vor.u32 %v4074_v10, %v4072_v17 }
 0x152   :  { %v2533_v46 = vpack.c.bf16 %v2452_v33, %v2451_v29  ;;  %v2399_v47 = vadd.f32 0.5, %v2289_v34  ;;  %v1390_v48 = vadd.f32 %v1389_v38, %v228_v0  ;;  %v1404_v51 = vadd.f32 %v1403_v39, %v229_v1  ;;  %v1415_v49 = vpop.f32.mrf.mxu0  ;;  %v1429_v50 = vpop.f32.mrf.mxu1  ;;  %v4042_v0 = vld [vmem:[#allocation2 + $0x354] sm:$0xf0]  ;;  %v4046_v1 = vld [vmem:[#allocation2 + $0x35c] sm:$0xf0] }
 0x153   :  { %v1416_v55 = vadd.f32 %v1415_v49, %v230_v31  ;;  %v1430_v57 = vadd.f32 %v1429_v50, %v231_v26  ;;  %v3040_v19 = vor.u32 %v4034_v54, %v4042_v0  ;;  %v3048_v22 = vor.u32 %v4044_v35, %v4046_v1  ;;  %v2825_v33 = vld [vmem:[#allocation2 + $0x1a4] sm:$0xf0]  ;;  %v3273_v35 = vld [vmem:[#allocation2 + $0x51c] sm:$0x70] }
 0x154   :  { %v3527_v60 = vpop.eup %3526  ;;  %2589 = vst [vmem:[%s4361_s3 + $0xe4] sm:$0xff] %v2533_v46  ;;  %v2506_v61 = vpack.c.bf16 %v2399_v47, %v2398_v37  ;;  %v2125_v62 = vmul.f32 0.5, %v1390_v48  ;;  %v2126_v63 = vmul.f32 0.5, %v1404_v51  ;;  %v2824_v29 = vor.u32 %v4059_v12, %v4052_v4  ;;  %v3500_v47 = vld [vmem:[#allocation2 + $0x520] sm:$0x70] }
 0x155   :  { %v3529_v5 = vpop.eup %3528  ;;  %v2290_v6 = vmul.f32 0.5, %v3527_v60  ;;  %v2072_v7 = vmul.f32 0.5, %v1416_v55  ;;  %v2073_v8 = vmul.f32 0.5, %v1430_v57  ;;  %3321 = vmatmul.msk.bf16.vlgmr.msra.gmra.mxu0 %vm1121_vm2, %v3809_v45  ;;  %3322 = vmatmul.msk.bf16.vlgmr.msra.gmra.mxu1 %vm1121_vm2, %v3809_v45  ;;  %v2820_v46 = vor.u32 %v3360_v23, %v2817_v24  ;;  %v3271_v48 = vld [vmem:[#allocation2 + $0x440] sm:$0xf] }
 0x156   :  { %v3531_v14 = vpop.eup %3530  ;;  %2562 = vst [vmem:[%s4361_s3 + $0x10] sm:$0xff] %v2506_v61  ;;  %v2291_v15 = vmul.f32 0.5, %v3529_v5  ;;  %3534 = vtanh.f32 %v2125_v62  ;;  %3323 = vmatmul.msk.bf16.vlgmr.msra.gmra.mxu2 %vm1121_vm2, %v3809_v45  ;;  %3324 = vmatmul.msk.bf16.vlgmr.msra.gmra.mxu3 %vm1121_vm2, %v3809_v45  ;;  %v3499_v51 = vld [vmem:[#allocation2 + $0x518] sm:$0x70]  ;;  %v3472_v55 = vld [vmem:[#allocation2 + $0x444] sm:$0xf]  ;;  %v3280_v62 = vor.u32 %v3500_v47, %v3279_v42 }
 0x157   :  { %v3533_v53 = vpop.eup %3532  ;;  %v2400_v18 = vadd.f32 0.5, %v2290_v6  ;;  %v2343_v56 = vmul.f32 0.5, %v3531_v14  ;;  %3536 = vtanh.f32 %v2126_v63  ;;  %1999 = vmatpush.bf16.msra.mxu2 %v1280_v41  ;;  %1971 = vmatpush.bf16.msra.mxu0 %v1274_v58  ;;  %v234_v0 = vperm.slane %v3937_v2, 4  ;;  %v3445_v24 = vld [vmem:[#allocation2 + $0x368] sm:$0xf0] }
 0x158   :  { %v2401_v20 = vadd.f32 0.5, %v2291_v15  ;;  %v2344_v21 = vmul.f32 0.5, %v3533_v53  ;;  %3538 = vtanh.f32 %v2072_v7  ;;  %1985 = vmatpush.bf16.msra.mxu1 %v1277_v59  ;;  %2013 = vmatpush.bf16.msra.mxu3 %v1283_v3  ;;  %v235_v61 = vperm.slane %v3937_v2, 5 }
 0x159   :  { %v2453_v25 = vadd.f32 0.5, %v2343_v56  ;;  %3540 = vtanh.f32 %v2073_v8  ;;  %v1443_v27 = vpop.f32.mrf.mxu2  ;;  %v1457_v28 = vpop.f32.mrf.mxu3  ;;  %v3272_v5 = vor.u32 %v3499_v51, %v3271_v48  ;;  %v3276_v8 = vor.u32 %v3472_v55, %v3273_v35  ;;  %v2833_v35 = vld [vmem:[#allocation2 + $0x1ac] sm:$0xf0] }
 0x15a   :  { %v2507_v34 = vpack.c.bf16 %v2401_v20, %v2400_v18  ;;  %v2454_v36 = vadd.f32 0.5, %v2344_v21  ;;  %v1444_v37 = vadd.f32 %v1443_v27, %v232_v40  ;;  %v1458_v38 = vadd.f32 %v1457_v28, %v233_v11  ;;  %v1417_v39 = vpop.f32.mrf.mxu0  ;;  %v1431_v41 = vpop.f32.mrf.mxu1  ;;  %v3444_v27 = vld [vmem:[#allocation2 + $0x360] sm:$0xf0] }
 0x15b   :  { %v1418_v43 = vadd.f32 %v1417_v39, %v230_v31  ;;  %v1432_v44 = vadd.f32 %v1431_v41, %v231_v26  ;;  %2000 = vmatpush.bf16.msra.mxu2 %v3044_v16  ;;  %1972 = vmatpush.bf16.msra.mxu0 %v3036_v9  ;;  %v2828_v31 = vor.u32 %v3361_v32, %v2825_v33  ;;  %v236_v16 = vperm.slane %v3937_v2, 6  ;;  %v3417_v32 = vld [vmem:[#allocation2 + $0x28c] sm:$0xf]  ;;  %v3053_v39 = vld [vmem:[#allocation2 + $0x364] sm:$0xf0] }
 0x15c   :  { %v3535_v49 = vpop.eup %3534  ;;  %2563 = vst [vmem:[%s4361_s3 + $0x18] sm:$0xff] %v2507_v34  ;;  %v2534_v50 = vpack.c.bf16 %v2454_v36, %v2453_v25  ;;  %v2074_v52 = vmul.f32 0.5, %v1444_v37  ;;  %v2075_v54 = vmul.f32 0.5, %v1458_v38  ;;  %1986 = vmatpush.bf16.msra.mxu1 %v3040_v19  ;;  %2014 = vmatpush.bf16.msra.mxu3 %v3048_v22  ;;  %v3059_v19 = vld [vmem:[#allocation2 + $0x290] sm:$0xf]  ;;  %v1292_v22 = vand.u32 %v3280_v62, %v3785_v13 }
 0x15d   :  { %v3537_v57 = vpop.eup %3536  ;;  %v2345_v26 = vmul.f32 0.5, %v3535_v49  ;;  %v2127_v58 = vmul.f32 0.5, %v1418_v43  ;;  %v2128_v59 = vmul.f32 0.5, %v1432_v44  ;;  %v1286_v23 = vand.u32 %v3272_v5, %v3785_v13  ;;  %v3051_v25 = vld [vmem:[#allocation2 + $0x288] sm:$0xf] }
 0x15e   :  { %v3539_v1 = vpop.eup %3538  ;;  %2590 = vst [vmem:[%s4361_s3 + $0xec] sm:$0xff] %v2534_v50  ;;  %v2346_v60 = vmul.f32 0.5, %v3537_v57  ;;  %3542 = vtanh.f32 %v2074_v52  ;;  %v237_v38 = vperm.slane %v3937_v2, 7  ;;  %v3060_v42 = vor.u32 %v3445_v24, %v3059_v19  ;;  %v2839_v43 = vld [vmem:[#allocation2 + $0xd8] sm:$0xf] }
 0x15f   :  { %v3541_v63 = vpop.eup %3540  ;;  %v2455_v3 = vadd.f32 0.5, %v2345_v26  ;;  %v2292_v4 = vmul.f32 0.5, %v3539_v1  ;;  %3544 = vtanh.f32 %v2075_v54  ;;  %2001 = vmatpush.bf16.msra.mxu2 %v2824_v29  ;;  %1973 = vmatpush.bf16.msra.mxu0 %v2816_v30  ;;  %v1289_v30 = vand.u32 %v3276_v8, %v3785_v13  ;;  %v3390_v44 = vld [vmem:[#allocation2 + $0x1b0] sm:$0xf0]  ;;  %v2831_v54 = vld [vmem:[#allocation2 + $0xd0] sm:$0xf] }
 0x160   :  { %v2456_v6 = vadd.f32 0.5, %v2346_v60  ;;  %v2293_v7 = vmul.f32 0.5, %v3541_v63  ;;  %3546 = vtanh.f32 %v2127_v58  ;;  %1987 = vmatpush.bf16.msra.mxu1 %v2820_v46  ;;  %2015 = vmatpush.bf16.msra.mxu3 %v2828_v31  ;;  %v3052_v51 = vor.u32 %v3444_v27, %v3051_v25  ;;  %v3389_v31 = vld [vmem:[#allocation2 + $0x1a8] sm:$0xf0] }
 0x161   :  { %v2402_v12 = vadd.f32 0.5, %v2292_v4  ;;  %3548 = vtanh.f32 %v2128_v59  ;;  %v1445_v14 = vpop.f32.mrf.mxu2  ;;  %v1459_v15 = vpop.f32.mrf.mxu3  ;;  %v3056_v52 = vor.u32 %v3417_v32, %v3053_v39  ;;  %v2840_v58 = vor.u32 %v3390_v44, %v2839_v43  ;;  %v3362_v59 = vld [vmem:[#allocation2 + $0xd4] sm:$0xf] }
 0x162   :  { %v2535_v9 = vpack.c.bf16 %v2456_v6, %v2455_v3  ;;  %v2403_v17 = vadd.f32 0.5, %v2293_v7  ;;  %v1446_v10 = vadd.f32 %v1445_v14, %v232_v40  ;;  %v1460_v53 = vadd.f32 %v1459_v15, %v233_v11  ;;  %v1471_v18 = vpop.f32.mrf.mxu0  ;;  %v1485_v56 = vpop.f32.mrf.mxu1  ;;  %v4138_v7 = vld [vmem:[%s4360_s2 + $0x10] sm:$0xff] }
 0x163   :  { %v1472_v20 = vadd.f32 %v1471_v18, %v234_v0  ;;  %v1486_v21 = vadd.f32 %v1485_v56, %v235_v61  ;;  %v2832_v8 = vor.u32 %v3389_v31, %v2831_v54  ;;  %v238_v19 = vperm.slane %v4138_v7, 0 }
 0x164   :  { %v3543_v40 = vpop.eup %3542  ;;  %2591 = vst [vmem:[%s4361_s3 + $0xf4] sm:$0xff] %v2535_v9  ;;  %v2508_v11 = vpack.c.bf16 %v2403_v17, %v2402_v12  ;;  %v2129_v28 = vmul.f32 0.5, %v1446_v10  ;;  %v2130_v29 = vmul.f32 0.5, %v1460_v53 }
 0x165   :  { %v3545_v33 = vpop.eup %3544  ;;  %v2294_v34 = vmul.f32 0.5, %v3543_v40  ;;  %v2076_v36 = vmul.f32 0.5, %v1472_v20  ;;  %v2077_v37 = vmul.f32 0.5, %v1486_v21  ;;  %3325 = vmatmul.msk.bf16.vlgmr.msrb.gmra.mxu0 %vm1121_vm2, %v3809_v45  ;;  %3326 = vmatmul.msk.bf16.vlgmr.msrb.gmra.mxu1 %vm1121_vm2, %v3809_v45 }
 0x166   :  { %v3547_v41 = vpop.eup %3546  ;;  %2564 = vst [vmem:[%s4361_s3 + $0x20] sm:$0xff] %v2508_v11  ;;  %v2295_v13 = vmul.f32 0.5, %v3545_v33  ;;  %3550 = vtanh.f32 %v2129_v28  ;;  %3327 = vmatmul.msk.bf16.vlgmr.msrb.gmra.mxu2 %vm1121_vm2, %v3809_v45  ;;  %3328 = vmatmul.msk.bf16.vlgmr.msrb.gmra.mxu3 %vm1121_vm2, %v3809_v45 }
 0x167   :  { %v3549_v46 = vpop.eup %3548  ;;  %v2404_v47 = vadd.f32 0.5, %v2294_v34  ;;  %v2347_v48 = vmul.f32 0.5, %v3547_v41  ;;  %3552 = vtanh.f32 %v2130_v29  ;;  %2055 = vmatpush.bf16.msrb.mxu2 %v1292_v22  ;;  %2027 = vmatpush.bf16.msrb.mxu0 %v1286_v23  ;;  %v239_v23 = vperm.slane %v4138_v7, 1 }
 0x168   :  { %v2405_v49 = vadd.f32 0.5, %v2295_v13  ;;  %v2348_v50 = vmul.f32 0.5, %v3549_v46  ;;  %3554 = vtanh.f32 %v2076_v36  ;;  %2041 = vmatpush.bf16.msrb.mxu1 %v1289_v30 }
 0x169   :  { %v2457_v55 = vadd.f32 0.5, %v2347_v48  ;;  %3556 = vtanh.f32 %v2077_v37  ;;  %v1499_v57 = vpop.f32.mrf.mxu2  ;;  %v1513_v26 = vpop.f32.mrf.mxu3  ;;  %v241_v48 = vperm.slane %v4138_v7, 3 }
 0x16a   :  { %v2509_v1 = vpack.c.bf16 %v2405_v49, %v2404_v47  ;;  %v2458_v60 = vadd.f32 0.5, %v2348_v50  ;;  %v1500_v62 = vadd.f32 %v1499_v57, %v236_v16  ;;  %v1514_v63 = vadd.f32 %v1513_v26, %v237_v38  ;;  %v1473_v3 = vpop.f32.mrf.mxu0  ;;  %v1487_v4 = vpop.f32.mrf.mxu1 }
 0x16b   :  { %v1474_v5 = vadd.f32 %v1473_v3, %v234_v0  ;;  %v1488_v6 = vadd.f32 %v1487_v4, %v235_v61  ;;  %2056 = vmatpush.bf16.msrb.mxu2 %v3060_v42  ;;  %2028 = vmatpush.bf16.msrb.mxu0 %v3052_v51  ;;  %v2836_v0 = vor.u32 %v3362_v59, %v2833_v35 }
 0x16c   :  { %v3551_v12 = vpop.eup %3550  ;;  %2565 = vst [vmem:[%s4361_s3 + $0x28] sm:$0xff] %v2509_v1  ;;  %v2536_v14 = vpack.c.bf16 %v2458_v60, %v2457_v55  ;;  %v2078_v15 = vmul.f32 0.5, %v1500_v62  ;;  %v2079_v9 = vmul.f32 0.5, %v1514_v63  ;;  %2042 = vmatpush.bf16.msrb.mxu1 %v3056_v52 }
 0x16d   :  { %v3553_v17 = vpop.eup %3552  ;;  %v2349_v61 = vmul.f32 0.5, %v3551_v12  ;;  %v2131_v10 = vmul.f32 0.5, %v1474_v5  ;;  %v2132_v53 = vmul.f32 0.5, %v1488_v6 }
 0x16e   :  { %v3555_v18 = vpop.eup %3554  ;;  %2592 = vst [vmem:[%s4361_s3 + $0xfc] sm:$0xff] %v2536_v14  ;;  %v2350_v56 = vmul.f32 0.5, %v3553_v17  ;;  %3558 = vtanh.f32 %v2078_v15  ;;  %v242_v17 = vperm.slane %v4138_v7, 4 }
 0x16f   :  { %v3557_v20 = vpop.eup %3556  ;;  %v2459_v21 = vadd.f32 0.5, %v2349_v61  ;;  %v2296_v22 = vmul.f32 0.5, %v3555_v18  ;;  %3560 = vtanh.f32 %v2079_v9  ;;  %2057 = vmatpush.bf16.msrb.mxu2 %v2840_v58  ;;  %2029 = vmatpush.bf16.msrb.mxu0 %v2832_v8  ;;  %v243_v18 = vperm.slane %v4138_v7, 5 }
 0x170   :  { %v2460_v24 = vadd.f32 0.5, %v2350_v56  ;;  %v2297_v25 = vmul.f32 0.5, %v3557_v20  ;;  %3562 = vtanh.f32 %v2131_v10  ;;  %2043 = vmatpush.bf16.msrb.mxu1 %v2836_v0 }
 0x171   :  { %v2406_v27 = vadd.f32 0.5, %v2296_v22  ;;  %3564 = vtanh.f32 %v2132_v53  ;;  %v1501_v40 = vpop.f32.mrf.mxu2  ;;  %v1515_v11 = vpop.f32.mrf.mxu3 }
 0x172   :  { %v2537_v28 = vpack.c.bf16 %v2460_v24, %v2459_v21  ;;  %v2407_v29 = vadd.f32 0.5, %v2297_v25  ;;  %v1502_v30 = vadd.f32 %v1501_v40, %v236_v16  ;;  %v1516_v32 = vadd.f32 %v1515_v11, %v237_v38  ;;  %v1527_v33 = vpop.f32.mrf.mxu0  ;;  %v1541_v34 = vpop.f32.mrf.mxu1 }
 0x173   :  { %v1528_v36 = vadd.f32 %v1527_v33, %v238_v19  ;;  %v1542_v37 = vadd.f32 %v1541_v34, %v239_v23  ;;  %v240_v38 = vperm.slane %v4138_v7, 2 }
 0x174   :  { %v3559_v39 = vpop.eup %3558  ;;  %2593 = vst [vmem:[%s4361_s3 + $0x104] sm:$0xff] %v2537_v28  ;;  %v2510_v41 = vpack.c.bf16 %v2407_v29, %v2406_v27  ;;  %v2133_v13 = vmul.f32 0.5, %v1502_v30  ;;  %v2134_v42 = vmul.f32 0.5, %v1516_v32 }
 0x175   :  { %v3561_v43 = vpop.eup %3560  ;;  %v2298_v44 = vmul.f32 0.5, %v3559_v39  ;;  %v2080_v46 = vmul.f32 0.5, %v1528_v36  ;;  %v2081_v47 = vmul.f32 0.5, %v1542_v37  ;;  %3329 = vmatmul.msk.bf16.vlgmr.msra.gmra.mxu0 %vm1121_vm2, %v3809_v45  ;;  %3330 = vmatmul.msk.bf16.vlgmr.msra.gmra.mxu1 %vm1121_vm2, %v3809_v45 }
 0x176   :  { %v3563_v2 = vpop.eup %3562  ;;  %2566 = vst [vmem:[%s4361_s3 + $0x30] sm:$0xff] %v2510_v41  ;;  %v2299_v16 = vmul.f32 0.5, %v3561_v43  ;;  %3566 = vtanh.f32 %v2133_v13  ;;  %3331 = vmatmul.msk.bf16.vlgmr.msra.gmra.mxu2 %vm1121_vm2, %v3809_v45  ;;  %3332 = vmatmul.msk.bf16.vlgmr.msra.gmra.mxu3 %vm1121_vm2, %v3809_v45  ;;  %v244_v43 = vperm.slane %v4138_v7, 6 }
 0x177   :  { %v3565_v51 = vpop.eup %3564  ;;  %v2408_v49 = vadd.f32 0.5, %v2298_v44  ;;  %v2351_v50 = vmul.f32 0.5, %v3563_v2  ;;  %3568 = vtanh.f32 %v2134_v42  ;;  %v245_v44 = vperm.slane %v4138_v7, 7  ;;  %v4193_v7 = vld [vmem:[%s4360_s2 + $0x18] sm:$0xff] }
 0x178   :  { %v2409_v52 = vadd.f32 0.5, %v2299_v16  ;;  %v2352_v54 = vmul.f32 0.5, %v3565_v51  ;;  %3570 = vtanh.f32 %v2080_v46 }
 0x179   :  { %v2461_v31 = vadd.f32 0.5, %v2351_v50  ;;  %3572 = vtanh.f32 %v2081_v47  ;;  %v1555_v55 = vpop.f32.mrf.mxu2  ;;  %v1569_v57 = vpop.f32.mrf.mxu3 }
 0x17a   :  { %v2511_v26 = vpack.c.bf16 %v2409_v52, %v2408_v49  ;;  %v2462_v58 = vadd.f32 0.5, %v2352_v54  ;;  %v1556_v59 = vadd.f32 %v1555_v55, %v240_v38  ;;  %v1570_v35 = vadd.f32 %v1569_v57, %v241_v48  ;;  %v1529_v1 = vpop.f32.mrf.mxu0  ;;  %v1543_v60 = vpop.f32.mrf.mxu1 }
 0x17b   :  { %v1530_v62 = vadd.f32 %v1529_v1, %v238_v19  ;;  %v1544_v63 = vadd.f32 %v1543_v60, %v239_v23 }
 0x17c   :  { %v3567_v3 = vpop.eup %3566  ;;  %2567 = vst [vmem:[%s4361_s3 + $0x38] sm:$0xff] %v2511_v26  ;;  %v2538_v4 = vpack.c.bf16 %v2462_v58, %v2461_v31  ;;  %v2082_v5 = vmul.f32 0.5, %v1556_v59  ;;  %v2083_v6 = vmul.f32 0.5, %v1570_v35 }
 0x17d   :  { %v3569_v8 = vpop.eup %3568  ;;  %v2353_v12 = vmul.f32 0.5, %v3567_v3  ;;  %v2135_v14 = vmul.f32 0.5, %v1530_v62  ;;  %v2136_v15 = vmul.f32 0.5, %v1544_v63 }
 0x17e   :  { %v3571_v9 = vpop.eup %3570  ;;  %2594 = vst [vmem:[%s4361_s3 + $0x10c] sm:$0xff] %v2538_v4  ;;  %v2354_v0 = vmul.f32 0.5, %v3569_v8  ;;  %3574 = vtanh.f32 %v2082_v5 }
 0x17f   :  { %v3573_v61 = vpop.eup %3572  ;;  %v2463_v10 = vadd.f32 0.5, %v2353_v12  ;;  %v2300_v53 = vmul.f32 0.5, %v3571_v9  ;;  %3576 = vtanh.f32 %v2083_v6  ;;  %v246_v6 = vperm.slane %v4193_v7, 0 }
 0x180   :  { %v2464_v56 = vadd.f32 0.5, %v2354_v0  ;;  %v2301_v19 = vmul.f32 0.5, %v3573_v61  ;;  %3578 = vtanh.f32 %v2135_v14 }
 0x181   :  { %v2410_v20 = vadd.f32 0.5, %v2300_v53  ;;  %3580 = vtanh.f32 %v2136_v15  ;;  %v1557_v21 = vpop.f32.mrf.mxu2  ;;  %v1571_v22 = vpop.f32.mrf.mxu3  ;;  %v247_v15 = vperm.slane %v4193_v7, 1 }
 0x182   :  { %v2539_v23 = vpack.c.bf16 %v2464_v56, %v2463_v10  ;;  %v2411_v24 = vadd.f32 0.5, %v2301_v19  ;;  %v1558_v25 = vadd.f32 %v1557_v21, %v240_v38  ;;  %v1572_v27 = vadd.f32 %v1571_v22, %v241_v48  ;;  %v1583_v40 = vpop.f32.mrf.mxu0  ;;  %v1597_v11 = vpop.f32.mrf.mxu1 }
 0x183   :  { %v1584_v28 = vadd.f32 %v1583_v40, %v242_v17  ;;  %v1598_v29 = vadd.f32 %v1597_v11, %v243_v18 }
 0x184   :  { %v3575_v30 = vpop.eup %3574  ;;  %2595 = vst [vmem:[%s4361_s3 + $0x114] sm:$0xff] %v2539_v23  ;;  %v2512_v32 = vpack.c.bf16 %v2411_v24, %v2410_v20  ;;  %v2137_v33 = vmul.f32 0.5, %v1558_v25  ;;  %v2138_v34 = vmul.f32 0.5, %v1572_v27 }
 0x185   :  { %v3577_v36 = vpop.eup %3576  ;;  %v2302_v37 = vmul.f32 0.5, %v3575_v30  ;;  %v2084_v39 = vmul.f32 0.5, %v1584_v28  ;;  %v2085_v41 = vmul.f32 0.5, %v1598_v29  ;;  %3333 = vmatmul.msk.bf16.vlgmr.msrb.gmra.mxu0 %vm1121_vm2, %v3809_v45  ;;  %3334 = vmatmul.msk.bf16.vlgmr.msrb.gmra.mxu1 %vm1121_vm2, %v3809_v45 }
 0x186   :  { %v3579_v13 = vpop.eup %3578  ;;  %2568 = vst [vmem:[%s4361_s3 + $0x40] sm:$0xff] %v2512_v32  ;;  %v2303_v42 = vmul.f32 0.5, %v3577_v36  ;;  %3582 = vtanh.f32 %v2137_v33  ;;  %3335 = vmatmul.msk.bf16.vlgmr.msrb.gmra.mxu2 %vm1121_vm2, %v3809_v45  ;;  %v249_v36 = vperm.slane %v4193_v7, 3 }
 0x187   :  { %v3581_v46 = vpop.eup %3580  ;;  %v2412_v47 = vadd.f32 0.5, %v2302_v37  ;;  %v2355_v2 = vmul.f32 0.5, %v3579_v13  ;;  %3584 = vtanh.f32 %v2138_v34  ;;  %v248_v34 = vperm.slane %v4193_v7, 2 }
 0x188   :  { %v2413_v16 = vadd.f32 0.5, %v2303_v42  ;;  %v2356_v38 = vmul.f32 0.5, %v3581_v46  ;;  %3586 = vtanh.f32 %v2084_v39 }
 0x189   :  { %v2465_v48 = vadd.f32 0.5, %v2355_v2  ;;  %3588 = vtanh.f32 %v2085_v41  ;;  %v1611_v51 = vpop.f32.mrf.mxu2  ;;  %v1625_v49 = vpop.f32.mrf.mxu3 }
 0x18a   :  { %v2513_v50 = vpack.c.bf16 %v2413_v16, %v2412_v47  ;;  %v2466_v52 = vadd.f32 0.5, %v2356_v38  ;;  %v1612_v54 = vadd.f32 %v1611_v51, %v244_v43  ;;  %v1626_v31 = vadd.f32 %v1625_v49, %v245_v44  ;;  %v1585_v45 = vpop.f32.mrf.mxu0  ;;  %v1599_v55 = vpop.f32.mrf.mxu1 }
 0x18b   :  { %v1586_v57 = vadd.f32 %v1585_v45, %v242_v17  ;;  %v1600_v26 = vadd.f32 %v1599_v55, %v243_v18 }
 0x18c   :  { %v3583_v58 = vpop.eup %3582  ;;  %2569 = vst [vmem:[%s4361_s3 + $0x48] sm:$0xff] %v2513_v50  ;;  %v2540_v59 = vpack.c.bf16 %v2466_v52, %v2465_v48  ;;  %v2086_v35 = vmul.f32 0.5, %v1612_v54  ;;  %v2087_v1 = vmul.f32 0.5, %v1626_v31 }
 0x18d   :  { %v3585_v60 = vpop.eup %3584  ;;  %v2357_v62 = vmul.f32 0.5, %v3583_v58  ;;  %v2139_v63 = vmul.f32 0.5, %v1586_v57  ;;  %v2140_v3 = vmul.f32 0.5, %v1600_v26 }
 0x18e   :  { %v3587_v4 = vpop.eup %3586  ;;  %2596 = vst [vmem:[%s4361_s3 + $0x11c] sm:$0xff] %v2540_v59  ;;  %v2358_v5 = vmul.f32 0.5, %v3585_v60  ;;  %3590 = vtanh.f32 %v2086_v35 }
 0x18f   :  { %v3589_v8 = vpop.eup %3588  ;;  %v2467_v12 = vadd.f32 0.5, %v2357_v62  ;;  %v2304_v14 = vmul.f32 0.5, %v3587_v4  ;;  %3592 = vtanh.f32 %v2087_v1  ;;  %v250_v1 = vperm.slane %v4193_v7, 4 }
 0x190   :  { %v2468_v9 = vadd.f32 0.5, %v2358_v5  ;;  %v2305_v0 = vmul.f32 0.5, %v3589_v8  ;;  %3594 = vtanh.f32 %v2139_v63 }
 0x191   :  { %v2414_v17 = vadd.f32 0.5, %v2304_v14  ;;  %3596 = vtanh.f32 %v2140_v3  ;;  %v1613_v61 = vpop.f32.mrf.mxu2  ;;  %v1627_v10 = vpop.f32.mrf.mxu3  ;;  %v251_v3 = vperm.slane %v4193_v7, 5 }
 0x192   :  { %v2541_v53 = vpack.c.bf16 %v2468_v9, %v2467_v12  ;;  %v2415_v18 = vadd.f32 0.5, %v2305_v0  ;;  %v1614_v56 = vadd.f32 %v1613_v61, %v244_v43  ;;  %v1628_v19 = vadd.f32 %v1627_v10, %v245_v44  ;;  %v1639_v20 = vpop.f32.mrf.mxu0  ;;  %v1653_v21 = vpop.f32.mrf.mxu1 }
 0x193   :  { %v1640_v22 = vadd.f32 %v1639_v20, %v246_v6  ;;  %v1654_v23 = vadd.f32 %v1653_v21, %v247_v15 }
 0x194   :  { %v3591_v24 = vpop.eup %3590  ;;  %2597 = vst [vmem:[%s4361_s3 + $0x124] sm:$0xff] %v2541_v53  ;;  %v2514_v25 = vpack.c.bf16 %v2415_v18, %v2414_v17  ;;  %v2141_v27 = vmul.f32 0.5, %v1614_v56  ;;  %v2142_v40 = vmul.f32 0.5, %v1628_v19 }
 0x195   :  { %v3593_v11 = vpop.eup %3592  ;;  %v2306_v28 = vmul.f32 0.5, %v3591_v24  ;;  %v2088_v29 = vmul.f32 0.5, %v1640_v22  ;;  %v2089_v30 = vmul.f32 0.5, %v1654_v23 }
 0x196   :  { %v3595_v32 = vpop.eup %3594  ;;  %2570 = vst [vmem:[%s4361_s3 + $0x50] sm:$0xff] %v2514_v25  ;;  %v2307_v33 = vmul.f32 0.5, %v3593_v11  ;;  %3598 = vtanh.f32 %v2141_v27  ;;  %v253_v11 = vperm.slane %v4193_v7, 7 }
 0x197   :  { %v3597_v37 = vpop.eup %3596  ;;  %v2416_v39 = vadd.f32 0.5, %v2306_v28  ;;  %v2359_v41 = vmul.f32 0.5, %v3595_v32  ;;  %3600 = vtanh.f32 %v2142_v40  ;;  %v252_v40 = vperm.slane %v4193_v7, 6  ;;  %v4230_v7 = vld [vmem:[%s4360_s2 + $0x20] sm:$0xff] }
 0x198   :  { %v2417_v13 = vadd.f32 0.5, %v2307_v33  ;;  %v2360_v42 = vmul.f32 0.5, %v3597_v37  ;;  %3602 = vtanh.f32 %v2088_v29 }
 0x199   :  { %v2469_v43 = vadd.f32 0.5, %v2359_v41  ;;  %3604 = vtanh.f32 %v2089_v30  ;;  %v1667_v44 = vpop.f32.mrf.mxu2  ;;  %v1681_v46 = vpop.f32.mrf.mxu3 }
 0x19a   :  { %v2515_v47 = vpack.c.bf16 %v2417_v13, %v2416_v39  ;;  %v2470_v2 = vadd.f32 0.5, %v2360_v42  ;;  %v1668_v16 = vadd.f32 %v1667_v44, %v248_v34  ;;  %v1682_v38 = vadd.f32 %v1681_v46, %v249_v36  ;;  %v1641_v48 = vpop.f32.mrf.mxu0  ;;  %v1655_v51 = vpop.f32.mrf.mxu1 }
 0x19b   :  { %v1642_v49 = vadd.f32 %v1641_v48, %v246_v6  ;;  %v1656_v50 = vadd.f32 %v1655_v51, %v247_v15 }
 0x19c   :  { %v3599_v52 = vpop.eup %3598  ;;  %2571 = vst [vmem:[%s4361_s3 + $0x58] sm:$0xff] %v2515_v47  ;;  %v2542_v54 = vpack.c.bf16 %v2470_v2, %v2469_v43  ;;  %v2090_v31 = vmul.f32 0.5, %v1668_v16  ;;  %v2091_v45 = vmul.f32 0.5, %v1682_v38 }
 0x19d   :  { %v3601_v55 = vpop.eup %3600  ;;  %v2361_v57 = vmul.f32 0.5, %v3599_v52  ;;  %v2143_v26 = vmul.f32 0.5, %v1642_v49  ;;  %v2144_v58 = vmul.f32 0.5, %v1656_v50 }
 0x19e   :  { %v3603_v59 = vpop.eup %3602  ;;  %2598 = vst [vmem:[%s4361_s3 + $0x12c] sm:$0xff] %v2542_v54  ;;  %v2362_v35 = vmul.f32 0.5, %v3601_v55  ;;  %3606 = vtanh.f32 %v2090_v31 }
 0x19f   :  { %v3605_v60 = vpop.eup %3604  ;;  %v2471_v62 = vadd.f32 0.5, %v2361_v57  ;;  %v2308_v63 = vmul.f32 0.5, %v3603_v59  ;;  %3608 = vtanh.f32 %v2091_v45  ;;  %v254_v45 = vperm.slane %v4230_v7, 0 }
 0x1a0   :  { %v2472_v4 = vadd.f32 0.5, %v2362_v35  ;;  %v2309_v5 = vmul.f32 0.5, %v3605_v60  ;;  %3610 = vtanh.f32 %v2143_v26 }
 0x1a1   :  { %v2418_v6 = vadd.f32 0.5, %v2308_v63  ;;  %3612 = vtanh.f32 %v2144_v58  ;;  %v1669_v8 = vpop.f32.mrf.mxu2  ;;  %v1683_v12 = vpop.f32.mrf.mxu3  ;;  %v255_v58 = vperm.slane %v4230_v7, 1 }
 0x1a2   :  { %v2543_v14 = vpack.c.bf16 %v2472_v4, %v2471_v62  ;;  %v2419_v15 = vadd.f32 0.5, %v2309_v5  ;;  %v1670_v9 = vadd.f32 %v1669_v8, %v248_v34  ;;  %v1684_v0 = vadd.f32 %v1683_v12, %v249_v36  ;;  %v1695_v17 = vpop.f32.mrf.mxu0  ;;  %v1709_v61 = vpop.f32.mrf.mxu1 }
 0x1a3   :  { %v1696_v10 = vadd.f32 %v1695_v17, %v250_v1  ;;  %v1710_v53 = vadd.f32 %v1709_v61, %v251_v3 }
 0x1a4   :  { %v3607_v18 = vpop.eup %3606  ;;  %2599 = vst [vmem:[%s4361_s3 + $0x134] sm:$0xff] %v2543_v14  ;;  %v2516_v56 = vpack.c.bf16 %v2419_v15, %v2418_v6  ;;  %v2145_v19 = vmul.f32 0.5, %v1670_v9  ;;  %v2146_v20 = vmul.f32 0.5, %v1684_v0 }
 0x1a5   :  { %v3609_v21 = vpop.eup %3608  ;;  %v2310_v22 = vmul.f32 0.5, %v3607_v18  ;;  %v2092_v23 = vmul.f32 0.5, %v1696_v10  ;;  %v2093_v24 = vmul.f32 0.5, %v1710_v53 }
 0x1a6   :  { %v3611_v25 = vpop.eup %3610  ;;  %2572 = vst [vmem:[%s4361_s3 + $0x60] sm:$0xff] %v2516_v56  ;;  %v2311_v27 = vmul.f32 0.5, %v3609_v21  ;;  %3614 = vtanh.f32 %v2145_v19  ;;  %v257_v21 = vperm.slane %v4230_v7, 3 }
 0x1a7   :  { %v3613_v28 = vpop.eup %3612  ;;  %v2420_v29 = vadd.f32 0.5, %v2310_v22  ;;  %v2363_v30 = vmul.f32 0.5, %v3611_v25  ;;  %3616 = vtanh.f32 %v2146_v20  ;;  %v256_v20 = vperm.slane %v4230_v7, 2 }
 0x1a8   :  { %v2421_v32 = vadd.f32 0.5, %v2311_v27  ;;  %v2364_v33 = vmul.f32 0.5, %v3613_v28  ;;  %3618 = vtanh.f32 %v2092_v23 }
 0x1a9   :  { %v2473_v34 = vadd.f32 0.5, %v2363_v30  ;;  %3620 = vtanh.f32 %v2093_v24  ;;  %v1723_v36 = vpop.f32.mrf.mxu2  ;;  %v1737_v37 = vpop.f32.mrf.mxu3 }
 0x1aa   :  { %v2517_v39 = vpack.c.bf16 %v2421_v32, %v2420_v29  ;;  %v2474_v41 = vadd.f32 0.5, %v2364_v33  ;;  %v1724_v13 = vadd.f32 %v1723_v36, %v252_v40  ;;  %v1738_v42 = vadd.f32 %v1737_v37, %v253_v11  ;;  %v1697_v43 = vpop.f32.mrf.mxu0  ;;  %v1711_v44 = vpop.f32.mrf.mxu1 }
 0x1ab   :  { %v1698_v46 = vadd.f32 %v1697_v43, %v250_v1  ;;  %v1712_v47 = vadd.f32 %v1711_v44, %v251_v3 }
 0x1ac   :  { %v3615_v2 = vpop.eup %3614  ;;  %2573 = vst [vmem:[%s4361_s3 + $0x68] sm:$0xff] %v2517_v39  ;;  %v2544_v16 = vpack.c.bf16 %v2474_v41, %v2473_v34  ;;  %v2094_v38 = vmul.f32 0.5, %v1724_v13  ;;  %v2095_v48 = vmul.f32 0.5, %v1738_v42 }
 0x1ad   :  { %v3617_v51 = vpop.eup %3616  ;;  %v2365_v49 = vmul.f32 0.5, %v3615_v2  ;;  %v2147_v50 = vmul.f32 0.5, %v1698_v46  ;;  %v2148_v52 = vmul.f32 0.5, %v1712_v47 }
 0x1ae   :  { %v3619_v54 = vpop.eup %3618  ;;  %2600 = vst [vmem:[%s4361_s3 + $0x13c] sm:$0xff] %v2544_v16  ;;  %v2366_v31 = vmul.f32 0.5, %v3617_v51  ;;  %3622 = vtanh.f32 %v2094_v38 }
 0x1af   :  { %v3621_v55 = vpop.eup %3620  ;;  %v2475_v57 = vadd.f32 0.5, %v2365_v49  ;;  %v2312_v26 = vmul.f32 0.5, %v3619_v54  ;;  %3624 = vtanh.f32 %v2095_v48  ;;  %v258_v48 = vperm.slane %v4230_v7, 4 }
 0x1b0   :  { %v2476_v59 = vadd.f32 0.5, %v2366_v31  ;;  %v2313_v35 = vmul.f32 0.5, %v3621_v55  ;;  %3626 = vtanh.f32 %v2147_v50 }
 0x1b1   :  { %v2422_v1 = vadd.f32 0.5, %v2312_v26  ;;  %3628 = vtanh.f32 %v2148_v52  ;;  %v1725_v60 = vpop.f32.mrf.mxu2  ;;  %v1739_v62 = vpop.f32.mrf.mxu3  ;;  %v259_v52 = vperm.slane %v4230_v7, 5 }
 0x1b2   :  { %v2545_v63 = vpack.c.bf16 %v2476_v59, %v2475_v57  ;;  %v2423_v3 = vadd.f32 0.5, %v2313_v35  ;;  %v1726_v4 = vadd.f32 %v1725_v60, %v252_v40  ;;  %v1740_v5 = vadd.f32 %v1739_v62, %v253_v11  ;;  %v1751_v6 = vpop.f32.mrf.mxu0  ;;  %v1765_v8 = vpop.f32.mrf.mxu1 }
 0x1b3   :  { %v1752_v12 = vadd.f32 %v1751_v6, %v254_v45  ;;  %v1766_v14 = vadd.f32 %v1765_v8, %v255_v58 }
 0x1b4   :  { %v3623_v15 = vpop.eup %3622  ;;  %2601 = vst [vmem:[%s4361_s3 + $0x144] sm:$0xff] %v2545_v63  ;;  %v2518_v9 = vpack.c.bf16 %v2423_v3, %v2422_v1  ;;  %v2149_v0 = vmul.f32 0.5, %v1726_v4  ;;  %v2150_v17 = vmul.f32 0.5, %v1740_v5 }
 0x1b5   :  { %v3625_v61 = vpop.eup %3624  ;;  %v2314_v10 = vmul.f32 0.5, %v3623_v15  ;;  %v2096_v53 = vmul.f32 0.5, %v1752_v12  ;;  %v2097_v18 = vmul.f32 0.5, %v1766_v14 }
 0x1b6   :  { %v3627_v56 = vpop.eup %3626  ;;  %2574 = vst [vmem:[%s4361_s3 + $0x70] sm:$0xff] %v2518_v9  ;;  %v2315_v19 = vmul.f32 0.5, %v3625_v61  ;;  %3630 = vtanh.f32 %v2149_v0  ;;  %v261_v61 = vperm.slane %v4230_v7, 7 }
 0x1b7   :  { %v3629_v22 = vpop.eup %3628  ;;  %v2424_v23 = vadd.f32 0.5, %v2314_v10  ;;  %v2367_v24 = vmul.f32 0.5, %v3627_v56  ;;  %3632 = vtanh.f32 %v2150_v17  ;;  %v260_v17 = vperm.slane %v4230_v7, 6  ;;  %v4267_v7 = vld [vmem:[%s4360_s2 + $0x28] sm:$0xff] }
 0x1b8   :  { %v2425_v25 = vadd.f32 0.5, %v2315_v19  ;;  %v2368_v27 = vmul.f32 0.5, %v3629_v22  ;;  %3634 = vtanh.f32 %v2096_v53 }
 0x1b9   :  { %v2477_v40 = vadd.f32 0.5, %v2367_v24  ;;  %3636 = vtanh.f32 %v2097_v18  ;;  %v1779_v11 = vpop.f32.mrf.mxu2  ;;  %v1793_v28 = vpop.f32.mrf.mxu3 }
 0x1ba   :  { %v2519_v29 = vpack.c.bf16 %v2425_v25, %v2424_v23  ;;  %v2478_v30 = vadd.f32 0.5, %v2368_v27  ;;  %v1780_v32 = vadd.f32 %v1779_v11, %v256_v20  ;;  %v1794_v33 = vadd.f32 %v1793_v28, %v257_v21  ;;  %v1753_v34 = vpop.f32.mrf.mxu0  ;;  %v1767_v36 = vpop.f32.mrf.mxu1 }
 0x1bb   :  { %v1754_v37 = vadd.f32 %v1753_v34, %v254_v45  ;;  %v1768_v39 = vadd.f32 %v1767_v36, %v255_v58 }
 0x1bc   :  { %v3631_v41 = vpop.eup %3630  ;;  %2575 = vst [vmem:[%s4361_s3 + $0x78] sm:$0xff] %v2519_v29  ;;  %v2546_v13 = vpack.c.bf16 %v2478_v30, %v2477_v40  ;;  %v2098_v42 = vmul.f32 0.5, %v1780_v32  ;;  %v2099_v43 = vmul.f32 0.5, %v1794_v33 }
 0x1bd   :  { %v3633_v44 = vpop.eup %3632  ;;  %v2369_v46 = vmul.f32 0.5, %v3631_v41  ;;  %v2151_v47 = vmul.f32 0.5, %v1754_v37  ;;  %v2152_v2 = vmul.f32 0.5, %v1768_v39 }
 0x1be   :  { %v3635_v16 = vpop.eup %3634  ;;  %2602 = vst [vmem:[%s4361_s3 + $0x14c] sm:$0xff] %v2546_v13  ;;  %v2370_v38 = vmul.f32 0.5, %v3633_v44  ;;  %3638 = vtanh.f32 %v2098_v42 }
 0x1bf   :  { %v3637_v51 = vpop.eup %3636  ;;  %v2479_v49 = vadd.f32 0.5, %v2369_v46  ;;  %v2316_v50 = vmul.f32 0.5, %v3635_v16  ;;  %3640 = vtanh.f32 %v2099_v43  ;;  %v262_v43 = vperm.slane %v4267_v7, 0 }
 0x1c0   :  { %v2480_v54 = vadd.f32 0.5, %v2370_v38  ;;  %v2317_v31 = vmul.f32 0.5, %v3637_v51  ;;  %3642 = vtanh.f32 %v2151_v47 }
 0x1c1   :  { %v2426_v45 = vadd.f32 0.5, %v2316_v50  ;;  %3644 = vtanh.f32 %v2152_v2  ;;  %v1781_v55 = vpop.f32.mrf.mxu2  ;;  %v1795_v57 = vpop.f32.mrf.mxu3  ;;  %v263_v2 = vperm.slane %v4267_v7, 1 }
 0x1c2   :  { %v2547_v26 = vpack.c.bf16 %v2480_v54, %v2479_v49  ;;  %v2427_v58 = vadd.f32 0.5, %v2317_v31  ;;  %v1782_v59 = vadd.f32 %v1781_v55, %v256_v20  ;;  %v1796_v35 = vadd.f32 %v1795_v57, %v257_v21  ;;  %v1807_v1 = vpop.f32.mrf.mxu0  ;;  %v1821_v60 = vpop.f32.mrf.mxu1 }
 0x1c3   :  { %v1808_v62 = vadd.f32 %v1807_v1, %v258_v48  ;;  %v1822_v63 = vadd.f32 %v1821_v60, %v259_v52 }
 0x1c4   :  { %v3639_v3 = vpop.eup %3638  ;;  %2603 = vst [vmem:[%s4361_s3 + $0x154] sm:$0xff] %v2547_v26  ;;  %v2520_v4 = vpack.c.bf16 %v2427_v58, %v2426_v45  ;;  %v2153_v5 = vmul.f32 0.5, %v1782_v59  ;;  %v2154_v6 = vmul.f32 0.5, %v1796_v35 }
 0x1c5   :  { %v3641_v8 = vpop.eup %3640  ;;  %v2318_v12 = vmul.f32 0.5, %v3639_v3  ;;  %v2100_v14 = vmul.f32 0.5, %v1808_v62  ;;  %v2101_v15 = vmul.f32 0.5, %v1822_v63 }
 0x1c6   :  { %v3643_v9 = vpop.eup %3642  ;;  %2576 = vst [vmem:[%s4361_s3 + $0x80] sm:$0xff] %v2520_v4  ;;  %v2319_v0 = vmul.f32 0.5, %v3641_v8  ;;  %3646 = vtanh.f32 %v2153_v5  ;;  %v265_v8 = vperm.slane %v4267_v7, 3 }
 0x1c7   :  { %v3645_v10 = vpop.eup %3644  ;;  %v2428_v53 = vadd.f32 0.5, %v2318_v12  ;;  %v2371_v18 = vmul.f32 0.5, %v3643_v9  ;;  %3648 = vtanh.f32 %v2154_v6  ;;  %v264_v6 = vperm.slane %v4267_v7, 2 }
 0x1c8   :  { %v2429_v56 = vadd.f32 0.5, %v2319_v0  ;;  %v2372_v19 = vmul.f32 0.5, %v3645_v10  ;;  %3650 = vtanh.f32 %v2100_v14 }
 0x1c9   :  { %v2481_v20 = vadd.f32 0.5, %v2371_v18  ;;  %3652 = vtanh.f32 %v2101_v15  ;;  %v1835_v21 = vpop.f32.mrf.mxu2  ;;  %v1849_v22 = vpop.f32.mrf.mxu3 }
 0x1ca   :  { %v2521_v23 = vpack.c.bf16 %v2429_v56, %v2428_v53  ;;  %v2482_v24 = vadd.f32 0.5, %v2372_v19  ;;  %v1836_v25 = vadd.f32 %v1835_v21, %v260_v17  ;;  %v1850_v27 = vadd.f32 %v1849_v22, %v261_v61  ;;  %v1809_v40 = vpop.f32.mrf.mxu0  ;;  %v1823_v11 = vpop.f32.mrf.mxu1 }
 0x1cb   :  { %v1810_v28 = vadd.f32 %v1809_v40, %v258_v48  ;;  %v1824_v29 = vadd.f32 %v1823_v11, %v259_v52 }
 0x1cc   :  { %v3647_v30 = vpop.eup %3646  ;;  %2577 = vst [vmem:[%s4361_s3 + $0x88] sm:$0xff] %v2521_v23  ;;  %v2548_v32 = vpack.c.bf16 %v2482_v24, %v2481_v20  ;;  %v2102_v33 = vmul.f32 0.5, %v1836_v25  ;;  %v2103_v34 = vmul.f32 0.5, %v1850_v27 }
 0x1cd   :  { %v3649_v36 = vpop.eup %3648  ;;  %v2373_v37 = vmul.f32 0.5, %v3647_v30  ;;  %v2155_v39 = vmul.f32 0.5, %v1810_v28  ;;  %v2156_v41 = vmul.f32 0.5, %v1824_v29 }
 0x1ce   :  { %v3651_v13 = vpop.eup %3650  ;;  %2604 = vst [vmem:[%s4361_s3 + $0x15c] sm:$0xff] %v2548_v32  ;;  %v2374_v42 = vmul.f32 0.5, %v3649_v36  ;;  %3654 = vtanh.f32 %v2102_v33 }
 0x1cf   :  { %v3653_v44 = vpop.eup %3652  ;;  %v2483_v46 = vadd.f32 0.5, %v2373_v37  ;;  %v2320_v47 = vmul.f32 0.5, %v3651_v13  ;;  %3656 = vtanh.f32 %v2103_v34  ;;  %v266_v34 = vperm.slane %v4267_v7, 4 }
 0x1d0   :  { %v2484_v16 = vadd.f32 0.5, %v2374_v42  ;;  %v2321_v38 = vmul.f32 0.5, %v3653_v44  ;;  %3658 = vtanh.f32 %v2155_v39 }
 0x1d1   :  { %v2430_v48 = vadd.f32 0.5, %v2320_v47  ;;  %3660 = vtanh.f32 %v2156_v41  ;;  %v1837_v51 = vpop.f32.mrf.mxu2  ;;  %v1851_v49 = vpop.f32.mrf.mxu3  ;;  %v267_v41 = vperm.slane %v4267_v7, 5 }
 0x1d2   :  { %v2549_v50 = vpack.c.bf16 %v2484_v16, %v2483_v46  ;;  %v2431_v52 = vadd.f32 0.5, %v2321_v38  ;;  %v1838_v54 = vadd.f32 %v1837_v51, %v260_v17  ;;  %v1852_v31 = vadd.f32 %v1851_v49, %v261_v61  ;;  %v1863_v45 = vpop.f32.mrf.mxu0  ;;  %v1877_v55 = vpop.f32.mrf.mxu1 }
 0x1d3   :  { %v1864_v57 = vadd.f32 %v1863_v45, %v262_v43  ;;  %v1878_v26 = vadd.f32 %v1877_v55, %v263_v2 }
 0x1d4   :  { %v3655_v58 = vpop.eup %3654  ;;  %2605 = vst [vmem:[%s4361_s3 + $0x164] sm:$0xff] %v2549_v50  ;;  %v2522_v59 = vpack.c.bf16 %v2431_v52, %v2430_v48  ;;  %v2157_v35 = vmul.f32 0.5, %v1838_v54  ;;  %v2158_v1 = vmul.f32 0.5, %v1852_v31 }
 0x1d5   :  { %v3657_v60 = vpop.eup %3656  ;;  %v2322_v62 = vmul.f32 0.5, %v3655_v58  ;;  %v2104_v63 = vmul.f32 0.5, %v1864_v57  ;;  %v2105_v3 = vmul.f32 0.5, %v1878_v26 }
 0x1d6   :  { %v3659_v4 = vpop.eup %3658  ;;  %2578 = vst [vmem:[%s4361_s3 + $0x90] sm:$0xff] %v2522_v59  ;;  %v2323_v5 = vmul.f32 0.5, %v3657_v60  ;;  %3662 = vtanh.f32 %v2157_v35  ;;  %v269_v60 = vperm.slane %v4267_v7, 7 }
 0x1d7   :  { %v3661_v12 = vpop.eup %3660  ;;  %v2432_v14 = vadd.f32 0.5, %v2322_v62  ;;  %v2375_v15 = vmul.f32 0.5, %v3659_v4  ;;  %3664 = vtanh.f32 %v2158_v1  ;;  %v268_v1 = vperm.slane %v4267_v7, 6  ;;  %v4304_v7 = vld [vmem:[%s4360_s2 + $0x30] sm:$0xff] }
 0x1d8   :  { %v2433_v9 = vadd.f32 0.5, %v2323_v5  ;;  %v2376_v0 = vmul.f32 0.5, %v3661_v12  ;;  %3666 = vtanh.f32 %v2104_v63 }
 0x1d9   :  { %v2485_v17 = vadd.f32 0.5, %v2375_v15  ;;  %3668 = vtanh.f32 %v2105_v3  ;;  %v1891_v61 = vpop.f32.mrf.mxu2  ;;  %v1905_v10 = vpop.f32.mrf.mxu3 }
 0x1da   :  { %v2523_v53 = vpack.c.bf16 %v2433_v9, %v2432_v14  ;;  %v2486_v18 = vadd.f32 0.5, %v2376_v0  ;;  %v1892_v56 = vadd.f32 %v1891_v61, %v264_v6  ;;  %v1906_v19 = vadd.f32 %v1905_v10, %v265_v8  ;;  %v1865_v20 = vpop.f32.mrf.mxu0  ;;  %v1879_v21 = vpop.f32.mrf.mxu1 }
 0x1db   :  { %v1866_v22 = vadd.f32 %v1865_v20, %v262_v43  ;;  %v1880_v23 = vadd.f32 %v1879_v21, %v263_v2 }
 0x1dc   :  { %v3663_v24 = vpop.eup %3662  ;;  %2579 = vst [vmem:[%s4361_s3 + $0x98] sm:$0xff] %v2523_v53  ;;  %v2550_v25 = vpack.c.bf16 %v2486_v18, %v2485_v17  ;;  %v2106_v27 = vmul.f32 0.5, %v1892_v56  ;;  %v2107_v40 = vmul.f32 0.5, %v1906_v19 }
 0x1dd   :  { %v3665_v11 = vpop.eup %3664  ;;  %v2377_v28 = vmul.f32 0.5, %v3663_v24  ;;  %v2159_v29 = vmul.f32 0.5, %v1866_v22  ;;  %v2160_v30 = vmul.f32 0.5, %v1880_v23 }
 0x1de   :  { %v3667_v32 = vpop.eup %3666  ;;  %2606 = vst [vmem:[%s4361_s3 + $0x16c] sm:$0xff] %v2550_v25  ;;  %v2378_v33 = vmul.f32 0.5, %v3665_v11  ;;  %3670 = vtanh.f32 %v2106_v27 }
 0x1df   :  { %v3669_v36 = vpop.eup %3668  ;;  %v2487_v37 = vadd.f32 0.5, %v2377_v28  ;;  %v2324_v39 = vmul.f32 0.5, %v3667_v32  ;;  %3672 = vtanh.f32 %v2107_v40  ;;  %v270_v40 = vperm.slane %v4304_v7, 0 }
 0x1e0   :  { %v2488_v13 = vadd.f32 0.5, %v2378_v33  ;;  %v2325_v42 = vmul.f32 0.5, %v3669_v36  ;;  %3674 = vtanh.f32 %v2159_v29 }
 0x1e1   :  { %v2434_v43 = vadd.f32 0.5, %v2324_v39  ;;  %3676 = vtanh.f32 %v2160_v30  ;;  %v1893_v44 = vpop.f32.mrf.mxu2  ;;  %v1907_v46 = vpop.f32.mrf.mxu3  ;;  %v271_v30 = vperm.slane %v4304_v7, 1 }
 0x1e2   :  { %v2551_v47 = vpack.c.bf16 %v2488_v13, %v2487_v37  ;;  %v2435_v2 = vadd.f32 0.5, %v2325_v42  ;;  %v1894_v16 = vadd.f32 %v1893_v44, %v264_v6  ;;  %v1908_v38 = vadd.f32 %v1907_v46, %v265_v8  ;;  %v1919_v48 = vpop.f32.mrf.mxu0  ;;  %v1933_v51 = vpop.f32.mrf.mxu1 }
 0x1e3   :  { %v1920_v49 = vadd.f32 %v1919_v48, %v266_v34  ;;  %v1934_v50 = vadd.f32 %v1933_v51, %v267_v41 }
 0x1e4   :  { %v3671_v52 = vpop.eup %3670  ;;  %2607 = vst [vmem:[%s4361_s3 + $0x174] sm:$0xff] %v2551_v47  ;;  %v2524_v54 = vpack.c.bf16 %v2435_v2, %v2434_v43  ;;  %v2161_v31 = vmul.f32 0.5, %v1894_v16  ;;  %v2162_v45 = vmul.f32 0.5, %v1908_v38 }
 0x1e5   :  { %v3673_v55 = vpop.eup %3672  ;;  %v2326_v57 = vmul.f32 0.5, %v3671_v52  ;;  %v2108_v26 = vmul.f32 0.5, %v1920_v49  ;;  %v2109_v58 = vmul.f32 0.5, %v1934_v50 }
 0x1e6   :  { %v3675_v59 = vpop.eup %3674  ;;  %2580 = vst [vmem:[%s4361_s3 + $0xa0] sm:$0xff] %v2524_v54  ;;  %v2327_v35 = vmul.f32 0.5, %v3673_v55  ;;  %3678 = vtanh.f32 %v2161_v31  ;;  %v273_v55 = vperm.slane %v4304_v7, 3 }
 0x1e7   :  { %v3677_v62 = vpop.eup %3676  ;;  %v2436_v63 = vadd.f32 0.5, %v2326_v57  ;;  %v2379_v3 = vmul.f32 0.5, %v3675_v59  ;;  %3680 = vtanh.f32 %v2162_v45  ;;  %v272_v45 = vperm.slane %v4304_v7, 2 }
 0x1e8   :  { %v2437_v4 = vadd.f32 0.5, %v2327_v35  ;;  %v2380_v5 = vmul.f32 0.5, %v3677_v62  ;;  %3682 = vtanh.f32 %v2108_v26 }
 0x1e9   :  { %v2489_v6 = vadd.f32 0.5, %v2379_v3  ;;  %3684 = vtanh.f32 %v2109_v58  ;;  %v1947_v8 = vpop.f32.mrf.mxu2  ;;  %v1961_v12 = vpop.f32.mrf.mxu3 }
 0x1ea   :  { %v2525_v14 = vpack.c.bf16 %v2437_v4, %v2436_v63  ;;  %v2490_v15 = vadd.f32 0.5, %v2380_v5  ;;  %v1948_v9 = vadd.f32 %v1947_v8, %v268_v1  ;;  %v1962_v0 = vadd.f32 %v1961_v12, %v269_v60  ;;  %v1921_v17 = vpop.f32.mrf.mxu0  ;;  %v1935_v61 = vpop.f32.mrf.mxu1 }
 0x1eb   :  { %v1922_v10 = vadd.f32 %v1921_v17, %v266_v34  ;;  %v1936_v53 = vadd.f32 %v1935_v61, %v267_v41 }
 0x1ec   :  { %v3679_v18 = vpop.eup %3678  ;;  %2581 = vst [vmem:[%s4361_s3 + $0xa8] sm:$0xff] %v2525_v14  ;;  %v2552_v56 = vpack.c.bf16 %v2490_v15, %v2489_v6  ;;  %v2110_v19 = vmul.f32 0.5, %v1948_v9  ;;  %v2111_v20 = vmul.f32 0.5, %v1962_v0 }
 0x1ed   :  { %v3681_v21 = vpop.eup %3680  ;;  %v2381_v22 = vmul.f32 0.5, %v3679_v18  ;;  %v2163_v23 = vmul.f32 0.5, %v1922_v10  ;;  %v2164_v24 = vmul.f32 0.5, %v1936_v53 }
 0x1ee   :  { %v3683_v25 = vpop.eup %3682  ;;  %2608 = vst [vmem:[%s4361_s3 + $0x17c] sm:$0xff] %v2552_v56  ;;  %v2382_v27 = vmul.f32 0.5, %v3681_v21  ;;  %3686 = vtanh.f32 %v2110_v19 }
 0x1ef   :  { %v3685_v11 = vpop.eup %3684  ;;  %v2491_v28 = vadd.f32 0.5, %v2381_v22  ;;  %v2328_v29 = vmul.f32 0.5, %v3683_v25  ;;  %3688 = vtanh.f32 %v2111_v20  ;;  %v274_v20 = vperm.slane %v4304_v7, 4 }
 0x1f0   :  { %v2492_v32 = vadd.f32 0.5, %v2382_v27  ;;  %v2329_v33 = vmul.f32 0.5, %v3685_v11  ;;  %3690 = vtanh.f32 %v2163_v23 }
 0x1f1   :  { %v2438_v34 = vadd.f32 0.5, %v2328_v29  ;;  %3692 = vtanh.f32 %v2164_v24  ;;  %v1949_v36 = vpop.f32.mrf.mxu2  ;;  %v1963_v37 = vpop.f32.mrf.mxu3  ;;  %v275_v24 = vperm.slane %v4304_v7, 5 }
 0x1f2   :  { %v2553_v39 = vpack.c.bf16 %v2492_v32, %v2491_v28  ;;  %v2439_v41 = vadd.f32 0.5, %v2329_v33  ;;  %v1950_v13 = vadd.f32 %v1949_v36, %v268_v1  ;;  %v1964_v42 = vadd.f32 %v1963_v37, %v269_v60  ;;  %v1975_v43 = vpop.f32.mrf.mxu0  ;;  %v1989_v44 = vpop.f32.mrf.mxu1 }
 0x1f3   :  { %v1976_v46 = vadd.f32 %v1975_v43, %v270_v40  ;;  %v1990_v47 = vadd.f32 %v1989_v44, %v271_v30 }
 0x1f4   :  { %v3687_v2 = vpop.eup %3686  ;;  %2609 = vst [vmem:[%s4361_s3 + $0x184] sm:$0xff] %v2553_v39  ;;  %v2526_v16 = vpack.c.bf16 %v2439_v41, %v2438_v34  ;;  %v2165_v38 = vmul.f32 0.5, %v1950_v13  ;;  %v2166_v48 = vmul.f32 0.5, %v1964_v42 }
 0x1f5   :  { %v3689_v51 = vpop.eup %3688  ;;  %v2330_v49 = vmul.f32 0.5, %v3687_v2  ;;  %v2112_v50 = vmul.f32 0.5, %v1976_v46  ;;  %v2113_v52 = vmul.f32 0.5, %v1990_v47 }
 0x1f6   :  { %v3691_v54 = vpop.eup %3690  ;;  %2582 = vst [vmem:[%s4361_s3 + $0xb0] sm:$0xff] %v2526_v16  ;;  %v2331_v31 = vmul.f32 0.5, %v3689_v51  ;;  %3694 = vtanh.f32 %v2165_v38 }
 0x1f7   :  { %v3693_v57 = vpop.eup %3692  ;;  %v2440_v26 = vadd.f32 0.5, %v2330_v49  ;;  %v2383_v58 = vmul.f32 0.5, %v3691_v54  ;;  %3696 = vtanh.f32 %v2166_v48  ;;  %v276_v48 = vperm.slane %v4304_v7, 6 }
 0x1f8   :  { %v2441_v59 = vadd.f32 0.5, %v2331_v31  ;;  %v2384_v35 = vmul.f32 0.5, %v3693_v57  ;;  %3698 = vtanh.f32 %v2112_v50 }
 0x1f9   :  { %v2493_v1 = vadd.f32 0.5, %v2383_v58  ;;  %3700 = vtanh.f32 %v2113_v52  ;;  %v2003_v60 = vpop.f32.mrf.mxu2  ;;  %v2017_v62 = vpop.f32.mrf.mxu3 }
 0x1fa   :  { %v2527_v63 = vpack.c.bf16 %v2441_v59, %v2440_v26  ;;  %v2494_v3 = vadd.f32 0.5, %v2384_v35  ;;  %v2004_v4 = vadd.f32 %v2003_v60, %v272_v45  ;;  %v2018_v5 = vadd.f32 %v2017_v62, %v273_v55  ;;  %v1977_v6 = vpop.f32.mrf.mxu0  ;;  %v1991_v8 = vpop.f32.mrf.mxu1 }
 0x1fb   :  { %v1978_v12 = vadd.f32 %v1977_v6, %v270_v40  ;;  %v1992_v14 = vadd.f32 %v1991_v8, %v271_v30 }
 0x1fc   :  { %v3695_v15 = vpop.eup %3694  ;;  %2583 = vst [vmem:[%s4361_s3 + $0xb8] sm:$0xff] %v2527_v63  ;;  %v2554_v9 = vpack.c.bf16 %v2494_v3, %v2493_v1  ;;  %v2114_v0 = vmul.f32 0.5, %v2004_v4  ;;  %v2115_v17 = vmul.f32 0.5, %v2018_v5 }
 0x1fd   :  { %v3697_v61 = vpop.eup %3696  ;;  %v2385_v10 = vmul.f32 0.5, %v3695_v15  ;;  %v2167_v53 = vmul.f32 0.5, %v1978_v12  ;;  %v2168_v18 = vmul.f32 0.5, %v1992_v14 }
 0x1fe   :  { %v3699_v56 = vpop.eup %3698  ;;  %2610 = vst [vmem:[%s4361_s3 + $0x18c] sm:$0xff] %v2554_v9  ;;  %v2386_v19 = vmul.f32 0.5, %v3697_v61  ;;  %3702 = vtanh.f32 %v2114_v0 }
 0x1ff   :  { %v3701_v21 = vpop.eup %3700  ;;  %v2495_v22 = vadd.f32 0.5, %v2385_v10  ;;  %v2332_v23 = vmul.f32 0.5, %v3699_v56  ;;  %3704 = vtanh.f32 %v2115_v17 }
 0x200   :  { %v2496_v25 = vadd.f32 0.5, %v2386_v19  ;;  %v2333_v27 = vmul.f32 0.5, %v3701_v21  ;;  %3706 = vtanh.f32 %v2167_v53 }
 0x201   :  { %v2442_v40 = vadd.f32 0.5, %v2332_v23  ;;  %3708 = vtanh.f32 %v2168_v18  ;;  %v2005_v11 = vpop.f32.mrf.mxu2  ;;  %v2019_v28 = vpop.f32.mrf.mxu3 }
 0x202   :  { %v2555_v29 = vpack.c.bf16 %v2496_v25, %v2495_v22  ;;  %v2443_v30 = vadd.f32 0.5, %v2333_v27  ;;  %v2006_v32 = vadd.f32 %v2005_v11, %v272_v45  ;;  %v2020_v33 = vadd.f32 %v2019_v28, %v273_v55  ;;  %v2031_v34 = vpop.f32.mrf.mxu0  ;;  %v2045_v36 = vpop.f32.mrf.mxu1 }
 0x203   :  { %v2032_v37 = vadd.f32 %v2031_v34, %v274_v20  ;;  %v2046_v39 = vadd.f32 %v2045_v36, %v275_v24 }
 0x204   :  { %v3703_v41 = vpop.eup %3702  ;;  %2611 = vst [vmem:[%s4361_s3 + $0x194] sm:$0xff] %v2555_v29  ;;  %v2528_v13 = vpack.c.bf16 %v2443_v30, %v2442_v40  ;;  %v2169_v42 = vmul.f32 0.5, %v2006_v32  ;;  %v2170_v43 = vmul.f32 0.5, %v2020_v33 }
 0x205   :  { %v3705_v44 = vpop.eup %3704  ;;  %v2334_v46 = vmul.f32 0.5, %v3703_v41  ;;  %v2116_v47 = vmul.f32 0.5, %v2032_v37  ;;  %v2117_v2 = vmul.f32 0.5, %v2046_v39 }
 0x206   :  { %v3707_v16 = vpop.eup %3706  ;;  %2584 = vst [vmem:[%s4361_s3 + $0xc0] sm:$0xff] %v2528_v13  ;;  %v2335_v38 = vmul.f32 0.5, %v3705_v44  ;;  %3710 = vtanh.f32 %v2169_v42 }
 0x207   :  { %v3709_v51 = vpop.eup %3708  ;;  %v2444_v49 = vadd.f32 0.5, %v2334_v46  ;;  %v2387_v50 = vmul.f32 0.5, %v3707_v16  ;;  %3712 = vtanh.f32 %v2170_v43 }
 0x208   :  { %v2445_v52 = vadd.f32 0.5, %v2335_v38  ;;  %v2388_v54 = vmul.f32 0.5, %v3709_v51  ;;  %3714 = vtanh.f32 %v2116_v47 }
 0x209   :  { %v2497_v31 = vadd.f32 0.5, %v2387_v50  ;;  %3716 = vtanh.f32 %v2117_v2  ;;  %v2059_v45 = vpop.f32.mrf.mxu2 }
 0x20a   :  { %v2529_v55 = vpack.c.bf16 %v2445_v52, %v2444_v49  ;;  %v2498_v57 = vadd.f32 0.5, %v2388_v54  ;;  %v2060_v26 = vadd.f32 %v2059_v45, %v276_v48  ;;  %v2033_v58 = vpop.f32.mrf.mxu0  ;;  %v2047_v59 = vpop.f32.mrf.mxu1 }
 0x20b   :  { %v2034_v35 = vadd.f32 %v2033_v58, %v274_v20  ;;  %v2048_v1 = vadd.f32 %v2047_v59, %v275_v24 }
 0x20c   :  { %v3711_v60 = vpop.eup %3710  ;;  %2585 = vst [vmem:[%s4361_s3 + $0xc8] sm:$0xff] %v2529_v55  ;;  %v2556_v7 = vpack.c.bf16 %v2498_v57, %v2497_v31  ;;  %v2118_v62 = vmul.f32 0.5, %v2060_v26 }
 0x20d   :  { %v3713_v63 = vpop.eup %3712  ;;  %v2389_v3 = vmul.f32 0.5, %v3711_v60  ;;  %v2171_v4 = vmul.f32 0.5, %v2034_v35  ;;  %v2172_v5 = vmul.f32 0.5, %v2048_v1 }
 0x20e   :  { %v3715_v6 = vpop.eup %3714  ;;  %2612 = vst [vmem:[%s4361_s3 + $0x19c] sm:$0xff] %v2556_v7  ;;  %v2390_v8 = vmul.f32 0.5, %v3713_v63  ;;  %3718 = vtanh.f32 %v2118_v62 }
 0x20f   :  { %v3717_v12 = vpop.eup %3716  ;;  %v2499_v14 = vadd.f32 0.5, %v2389_v3  ;;  %v2336_v15 = vmul.f32 0.5, %v3715_v6  ;;  %3720 = vtanh.f32 %v2171_v4 }
 0x210   :  { %v2500_v9 = vadd.f32 0.5, %v2390_v8  ;;  %v2337_v0 = vmul.f32 0.5, %v3717_v12  ;;  %3722 = vtanh.f32 %v2172_v5 }
 0x211   :  { %v2446_v17 = vadd.f32 0.5, %v2336_v15  ;;  %v2061_v61 = vpop.f32.mrf.mxu2 }
 0x212   :  { %v2557_v10 = vpack.c.bf16 %v2500_v9, %v2499_v14  ;;  %v2447_v53 = vadd.f32 0.5, %v2337_v0  ;;  %v2062_v18 = vadd.f32 %v2061_v61, %v276_v48 }
 0x214   :  { %v3719_v56 = vpop.eup %3718  ;;  %2613 = vst [vmem:[%s4361_s3 + $0x1a4] sm:$0xff] %v2557_v10  ;;  %v2530_v19 = vpack.c.bf16 %v2447_v53, %v2446_v17  ;;  %v2173_v20 = vmul.f32 0.5, %v2062_v18 }
 0x215   :  { %v3721_v21 = vpop.eup %3720  ;;  %v2338_v22 = vmul.f32 0.5, %v3719_v56 }
 0x216   :  { %v3723_v23 = vpop.eup %3722  ;;  %2586 = vst [vmem:[%s4361_s3 + $0xd0] sm:$0xff] %v2530_v19  ;;  %v2391_v24 = vmul.f32 0.5, %v3721_v21  ;;  %3724 = vtanh.f32 %v2173_v20 }
 0x217   :  { %v2448_v25 = vadd.f32 0.5, %v2338_v22  ;;  %v2392_v27 = vmul.f32 0.5, %v3723_v23 }
 0x218   :  { %v2501_v40 = vadd.f32 0.5, %v2391_v24 }
 0x219   :  { %v2531_v11 = vpack.c.bf16 %v2448_v25, %v2448_v25  ;;  %v2502_v28 = vadd.f32 0.5, %v2392_v27 }
 0x21b   :  { %2587 = vst [vmem:[%s4361_s3 + $0xd8] sm:$0xf] %v2531_v11  ;;  %v2558_v29 = vpack.c.bf16 %v2502_v28, %v2501_v40 }
 0x21c   :  { %v3725_v30 = vpop.eup %3724 }
 0x21d   :  { %2614 = vst [vmem:[%s4361_s3 + $0x1ac] sm:$0xff] %v2558_v29  ;;  %v2393_v32 = vmul.f32 0.5, %v3725_v30 }
 0x21f   :  { %v2503_v33 = vadd.f32 0.5, %v2393_v32 }
 0x221   :  { %v2559_v34 = vpack.c.bf16 %v2503_v33, %v2503_v33 }
 0x223   :  { %2615 = vst [vmem:[%s4361_s3 + $0x1b4] sm:$0xf] %v2559_v34 }
 0x224   :  { %2620 = vsyncpa [#allocation3], 1 }

</bundles_post_ra>
